<compile_context>
chip_gen: v7x
topology: tpu7x:2x2x1
jax: 0.10.0
libtpu: 0.0.40
codegen_flags: <defaults>
</compile_context>

<pallas_src>
import jax
import jax.numpy as jnp
from jax.experimental import pallas as pl
from jax.experimental.pallas import tpu as pltpu

_BN_EPS = 1e-5


# ----------------------------------------------------------------------------
# Fused kernel: (M, 64) -> (M, 1024), three chained MXU matmuls + bias + relu
# ----------------------------------------------------------------------------

def _smlp2_kernel(x_ref, w1_ref, b1_ref, w2_ref, b2_ref, w3_ref, b3_ref, o_ref):
    # conv1 + bn1 + relu (BN scale pre-folded into W1; epilogue in f32)
    h = jnp.dot(x_ref[...], w1_ref[...], preferred_element_type=jnp.float32)
    h = jnp.maximum(h + b1_ref[...], 0.0)
    # conv2 + bn2 + relu
    h = jnp.dot(h.astype(w2_ref.dtype), w2_ref[...],
                preferred_element_type=jnp.float32)
    h = jnp.maximum(h + b2_ref[...], 0.0)
    # conv3 + bn3 + relu  (lane-dense 1024-wide output)
    h = jnp.dot(h.astype(w3_ref.dtype), w3_ref[...],
                preferred_element_type=jnp.float32)
    o_ref[...] = jnp.maximum(h + b3_ref[...], 0.0)


def s_mlp_2_forward(x_bcn, params):
    """x_bcn: (B, 64, N) float32 (PyTorch NCW).  Returns (B, 1024, N) float32."""
    B, Cin, N = x_bcn.shape
    w1, b1 = params["w1"], params["b1"]
    w2, b2 = params["w2"], params["b2"]
    w3, b3 = params["w3"], params["b3"]
    Cout = w3.shape[1]

    # Flatten batch into the matmul M dimension; cast activations to bf16
    # at the kernel boundary (halves activation DMA, feeds the MXU natively).
    x = jnp.transpose(x_bcn, (0, 2, 1)).reshape(B * N, Cin).astype(w1.dtype)
    M = B * N

    # 2 M-tiles -> 2-wide "parallel" grid axis (v7x megacore); else 1 tile.
    grid_m = 2 if (M % 2 == 0 and (M // 2) % 8 == 0) else 1
    tm = M // grid_m

    flops = 2 * M * (w1.shape[0] * w1.shape[1]
                     + w2.shape[0] * w2.shape[1]
                     + w3.shape[0] * w3.shape[1])
    bytes_accessed = (
        x.size * x.dtype.itemsize
        + sum(int(a.size) * a.dtype.itemsize for a in (w1, b1, w2, b2, w3, b3))
        + M * Cout * 4)

    out_flat = pl.pallas_call(
        _smlp2_kernel,
        out_shape=jax.ShapeDtypeStruct((M, Cout), jnp.float32),
        grid=(grid_m,),
        in_specs=[
            pl.BlockSpec((tm, Cin), lambda i: (i, 0)),     # activations, tiled on M
            pl.BlockSpec(w1.shape, lambda i: (0, 0)),      # weights: grid-constant,
            pl.BlockSpec(b1.shape, lambda i: (0, 0)),      # resident in VMEM
            pl.BlockSpec(w2.shape, lambda i: (0, 0)),
            pl.BlockSpec(b2.shape, lambda i: (0, 0)),
            pl.BlockSpec(w3.shape, lambda i: (0, 0)),
            pl.BlockSpec(b3.shape, lambda i: (0, 0)),
        ],
        out_specs=pl.BlockSpec((tm, Cout), lambda i: (i, 0)),
        compiler_params=pltpu.CompilerParams(
            dimension_semantics=("parallel",)),
        cost_estimate=pl.CostEstimate(flops=flops, transcendentals=0,
                                      bytes_accessed=bytes_accessed),
    )(x, w1, b1, w2, b2, w3, b3)

    # (B*N, 1024) -> (B, 1024, N) to match the PyTorch NCW output layout.
    return jnp.transpose(out_flat.reshape(B, N, Cout), (0, 2, 1))


# ----------------------------------------------------------------------------
# Parameters: Conv1d(cin, cout, 1) + BatchNorm1d(cout), BN folded into W / bias
# ----------------------------------------------------------------------------

def _make_conv_bn_folded(key, cin, cout, compute_dtype=jnp.bfloat16):
    ks = jax.random.split(key, 6)
    w = jax.random.normal(ks[0], (cin, cout), jnp.float32) * 0.05
    bias = jax.random.normal(ks[1], (cout,), jnp.float32) * 0.05
    gamma = jax.random.uniform(ks[2], (cout,), jnp.float32, minval=0.5, maxval=1.5)
    beta = jax.random.normal(ks[3], (cout,), jnp.float32) * 0.05
    mean = jax.random.normal(ks[4], (cout,), jnp.float32) * 0.05
    var = jax.random.uniform(ks[5], (cout,), jnp.float32, minval=0.5, maxval=1.5)

    scale = gamma / jnp.sqrt(var + _BN_EPS)                 # (cout,)
    w_folded = (w * scale[None, :]).astype(compute_dtype)   # fold BN scale into W
    shift = ((bias - mean) * scale + beta)[None, :]         # f32 (1, cout) bias row
    return w_folded, shift.astype(jnp.float32), w, bias, gamma, beta, mean, var


def make_smlp2_params(key, compute_dtype=jnp.bfloat16):
    ks = jax.random.split(key, 3)
    w1, b1, *raw1 = _make_conv_bn_folded(ks[0], 64, 64, compute_dtype)
    w2, b2, *raw2 = _make_conv_bn_folded(ks[1], 64, 128, compute_dtype)
    w3, b3, *raw3 = _make_conv_bn_folded(ks[2], 128, 1024, compute_dtype)
    params = {"w1": w1, "b1": b1, "w2": w2, "b2": b2, "w3": w3, "b3": b3}
    raw = {"l1": raw1, "l2": raw2, "l3": raw3}
    return params, raw


# ----------------------------------------------------------------------------
# Pure-JAX f32 reference (eval-mode BN), used only for a tolerance check
# ----------------------------------------------------------------------------

def _reference_forward(x_bcn, raw):
    x = jnp.transpose(x_bcn, (0, 2, 1))                     # (B, N, C)
    for name in ("l1", "l2", "l3"):
        w, bias, gamma, beta, mean, var = raw[name]
        y = jnp.einsum("bnc,cd->bnd", x, w) + bias[None, None, :]
        y = (y - mean) / jnp.sqrt(var + _BN_EPS) * gamma + beta
        x = jnp.maximum(y, 0.0)
    return jnp.transpose(x, (0, 2, 1))                      # (B, Cout, N)


# ----------------------------------------------------------------------------
# Main
# ----------------------------------------------------------------------------

if __name__ == "__main__":
    B, C_IN, N = 2, 64, 128
    key = jax.random.PRNGKey(0)
    key_x, key_p = jax.random.split(key)

    x = jax.random.normal(key_x, (B, C_IN, N), jnp.float32)   # NCW, like PyTorch
    params, raw = make_smlp2_params(key_p)

    out = s_mlp_2_forward(x, params)
    jax.block_until_ready(out)

    assert out.shape == (B, 1024, N), out.shape
    assert out.dtype == jnp.float32

    # Loose tolerance: kernel uses bf16 operands with f32 accumulation.
    ref = _reference_forward(x, raw)
    err = jnp.max(jnp.abs(out - ref))
    assert float(err) < 0.1, f"max abs error {float(err)}"

    print("KERNEL_OK")
</pallas_src>

<mosaic_0001>
module attributes {stable_mosaic.version = 11 : i64} {
  func.func @_smlp2_kernel(%arg0: i32, %arg1: memref<128x64xbf16, #tpu.memory_space<vmem>>, %arg2: memref<64x64xbf16, #tpu.memory_space<vmem>>, %arg3: memref<1x64xf32, #tpu.memory_space<vmem>>, %arg4: memref<64x128xbf16, #tpu.memory_space<vmem>>, %arg5: memref<1x128xf32, #tpu.memory_space<vmem>>, %arg6: memref<128x1024xbf16, #tpu.memory_space<vmem>>, %arg7: memref<1x1024xf32, #tpu.memory_space<vmem>>, %arg8: memref<128x1024xf32, #tpu.memory_space<vmem>>) attributes {dimension_semantics = [#tpu.dimension_semantics<parallel>], iteration_bounds = array<i64: 2>, scalar_prefetch = 0 : i64, scratch_operands = 0 : i64, tpu.core_type = #tpu.core_type<tc>, window_params = [{transform_indices = @transform_0, window_bounds = array<i64: 128, 64>}, {pipeline_mode = #tpu.pipeline_mode<synchronous>, transform_indices = @transform_1, window_bounds = array<i64: 64, 64>}, {pipeline_mode = #tpu.pipeline_mode<synchronous>, transform_indices = @transform_2, window_bounds = array<i64: 1, 64>}, {pipeline_mode = #tpu.pipeline_mode<synchronous>, transform_indices = @transform_3, window_bounds = array<i64: 64, 128>}, {pipeline_mode = #tpu.pipeline_mode<synchronous>, transform_indices = @transform_4, window_bounds = array<i64: 1, 128>}, {pipeline_mode = #tpu.pipeline_mode<synchronous>, transform_indices = @transform_5, window_bounds = array<i64: 128, 1024>}, {pipeline_mode = #tpu.pipeline_mode<synchronous>, transform_indices = @transform_6, window_bounds = array<i64: 1, 1024>}, {transform_indices = @transform_7, window_bounds = array<i64: 128, 1024>}]} {
    %c0 = arith.constant 0 : index
    %c0_0 = arith.constant 0 : index
    %0 = vector.load %arg1[%c0, %c0_0] : memref<128x64xbf16, #tpu.memory_space<vmem>>, vector<128x64xbf16>
    %c0_1 = arith.constant 0 : index
    %c0_2 = arith.constant 0 : index
    %1 = vector.load %arg2[%c0_1, %c0_2] : memref<64x64xbf16, #tpu.memory_space<vmem>>, vector<64x64xbf16>
    %cst = arith.constant dense<0.000000e+00> : vector<128x64xf32>
    %2 = tpu.matmul %0, %1, %cst {dimension_numbers = #tpu.dot_dimension_numbers<[1], [0], [0], [1], [0, 0, 1, 1], [], []>} : vector<128x64xbf16>, vector<64x64xbf16>, vector<128x64xf32> -> vector<128x64xf32>
    %c0_3 = arith.constant 0 : index
    %c0_4 = arith.constant 0 : index
    %3 = vector.load %arg3[%c0_3, %c0_4] : memref<1x64xf32, #tpu.memory_space<vmem>>, vector<1x64xf32>
    %4 = vector.broadcast %3 : vector<1x64xf32> to vector<128x64xf32>
    %5 = arith.addf %2, %4 : vector<128x64xf32>
    %cst_5 = arith.constant 0.000000e+00 : f32
    %6 = vector.broadcast %cst_5 : f32 to vector<128x64xf32>
    %7 = arith.maximumf %5, %6 : vector<128x64xf32>
    %8 = arith.truncf %7 : vector<128x64xf32> to vector<128x64xbf16>
    %c0_6 = arith.constant 0 : index
    %c0_7 = arith.constant 0 : index
    %9 = vector.load %arg4[%c0_6, %c0_7] : memref<64x128xbf16, #tpu.memory_space<vmem>>, vector<64x128xbf16>
    %cst_8 = arith.constant dense<0.000000e+00> : vector<128x128xf32>
    %10 = tpu.matmul %8, %9, %cst_8 {dimension_numbers = #tpu.dot_dimension_numbers<[1], [0], [0], [1], [0, 0, 1, 1], [], []>} : vector<128x64xbf16>, vector<64x128xbf16>, vector<128x128xf32> -> vector<128x128xf32>
    %c0_9 = arith.constant 0 : index
    %c0_10 = arith.constant 0 : index
    %11 = vector.load %arg5[%c0_9, %c0_10] : memref<1x128xf32, #tpu.memory_space<vmem>>, vector<1x128xf32>
    %12 = vector.broadcast %11 : vector<1x128xf32> to vector<128x128xf32>
    %13 = arith.addf %10, %12 : vector<128x128xf32>
    %cst_11 = arith.constant 0.000000e+00 : f32
    %14 = vector.broadcast %cst_11 : f32 to vector<128x128xf32>
    %15 = arith.maximumf %13, %14 : vector<128x128xf32>
    %16 = arith.truncf %15 : vector<128x128xf32> to vector<128x128xbf16>
    %c0_12 = arith.constant 0 : index
    %c0_13 = arith.constant 0 : index
    %17 = vector.load %arg6[%c0_12, %c0_13] : memref<128x1024xbf16, #tpu.memory_space<vmem>>, vector<128x1024xbf16>
    %cst_14 = arith.constant dense<0.000000e+00> : vector<128x1024xf32>
    %18 = tpu.matmul %16, %17, %cst_14 {dimension_numbers = #tpu.dot_dimension_numbers<[1], [0], [0], [1], [0, 0, 1, 1], [], []>} : vector<128x128xbf16>, vector<128x1024xbf16>, vector<128x1024xf32> -> vector<128x1024xf32>
    %c0_15 = arith.constant 0 : index
    %c0_16 = arith.constant 0 : index
    %19 = vector.load %arg7[%c0_15, %c0_16] : memref<1x1024xf32, #tpu.memory_space<vmem>>, vector<1x1024xf32>
    %20 = vector.broadcast %19 : vector<1x1024xf32> to vector<128x1024xf32>
    %21 = arith.addf %18, %20 : vector<128x1024xf32>
    %cst_17 = arith.constant 0.000000e+00 : f32
    %22 = vector.broadcast %cst_17 : f32 to vector<128x1024xf32>
    %23 = arith.maximumf %21, %22 : vector<128x1024xf32>
    %c0_18 = arith.constant 0 : index
    %c0_19 = arith.constant 0 : index
    %24 = vector.load %arg8[%c0_18, %c0_19] : memref<128x1024xf32, #tpu.memory_space<vmem>>, vector<128x1024xf32>
    tpu.vector_store %arg8[%c0_18, %c0_19], %23 {strides = array<i32>} : memref<128x1024xf32, #tpu.memory_space<vmem>>, vector<128x1024xf32>,
    return
  }
  func.func @transform_0(%arg0: i32) -> (i32, i32) {
    %c0_i32 = arith.constant 0 : i32
    %c0_i32_0 = arith.constant 0 : i32
    return %arg0, %c0_i32 : i32, i32
  }
  func.func @transform_1(%arg0: i32) -> (i32, i32) {
    %c0_i32 = arith.constant 0 : i32
    %c0_i32_0 = arith.constant 0 : i32
    %c0_i32_1 = arith.constant 0 : i32
    return %c0_i32, %c0_i32_0 : i32, i32
  }
  func.func @transform_2(%arg0: i32) -> (i32, i32) {
    %c0_i32 = arith.constant 0 : i32
    %c0_i32_0 = arith.constant 0 : i32
    %c0_i32_1 = arith.constant 0 : i32
    return %c0_i32, %c0_i32_0 : i32, i32
  }
  func.func @transform_3(%arg0: i32) -> (i32, i32) {
    %c0_i32 = arith.constant 0 : i32
    %c0_i32_0 = arith.constant 0 : i32
    %c0_i32_1 = arith.constant 0 : i32
    return %c0_i32, %c0_i32_0 : i32, i32
  }
  func.func @transform_4(%arg0: i32) -> (i32, i32) {
    %c0_i32 = arith.constant 0 : i32
    %c0_i32_0 = arith.constant 0 : i32
    %c0_i32_1 = arith.constant 0 : i32
    return %c0_i32, %c0_i32_0 : i32, i32
  }
  func.func @transform_5(%arg0: i32) -> (i32, i32) {
    %c0_i32 = arith.constant 0 : i32
    %c0_i32_0 = arith.constant 0 : i32
    %c0_i32_1 = arith.constant 0 : i32
    return %c0_i32, %c0_i32_0 : i32, i32
  }
  func.func @transform_6(%arg0: i32) -> (i32, i32) {
    %c0_i32 = arith.constant 0 : i32
    %c0_i32_0 = arith.constant 0 : i32
    %c0_i32_1 = arith.constant 0 : i32
    return %c0_i32, %c0_i32_0 : i32, i32
  }
  func.func @transform_7(%arg0: i32) -> (i32, i32) {
    %c0_i32 = arith.constant 0 : i32
    %c0_i32_0 = arith.constant 0 : i32
    return %arg0, %c0_i32 : i32, i32
  }
}

</mosaic_0001>

<bundles_post_ra>
// kernel: tpu_custom_call.1
= control target key start
LH: loop header
LB: loop body
LE: loop exit
PB: predicated region body
PF: predicated region fallthrough
CT: control target
= control target key end

     0   :  { %12 = vsyncpa [#allocation3], 0  ;;  %s2961_s0 = inlined_call_operand.vmem [shape: bf16[256,64], index: 0, kind: input, shape index: {}]   ;;  %s2962_s1 = inlined_call_operand.vmem [shape: bf16[64,64], index: 1, kind: input, shape index: {}]   ;;  %s2963_s2 = inlined_call_operand.vmem [shape: f32[1,64], index: 2, kind: input, shape index: {}]   ;;  %s2964_s3 = inlined_call_operand.vmem [shape: bf16[64,128], index: 3, kind: input, shape index: {}]   ;;  %s2965_s4 = inlined_call_operand.vmem [shape: f32[1,128], index: 4, kind: input, shape index: {}]   ;;  %s2966_s5 = inlined_call_operand.hbm [shape: bf16[128,1024], index: 5, kind: input, shape index: {}]   ;;  %s2967_s6 = inlined_call_operand.vmem [shape: f32[1,1024], index: 6, kind: input, shape index: {}]   ;;  %s2968_s7 = inlined_call_operand.hbm [shape: f32[256,1024], index: 7, kind: output, shape index: {}]  }
   0x1   :  { %13 = vsyncpa [#allocation4], 0 }
   0x2   :  { %15 = vsyncpa [#allocation4 + $0x1], 0  ;;  %s2345_s24 = smov 0   ;;  %s2347_s25 = smov 0  }
   0x3   :  { %s2349_s26 = smov 0   ;;  %s2351_s27 = smov 0  }
   0x4 LB: > { %s2366_s28 = sadd.s32 4294967295, %s2296_s27   ;;  %s1944_s29 = sadd.s32 4294967294, %s2296_s27   ;;  %s2296_s27 = sphi %s2351_s27, %s2984_s27   ;;  %s2292_s26 = sphi %s2349_s26, %s2983_s26   ;;  %s2288_s25 = sphi %s2347_s25, %s2982_s25   ;;  %s2284_s24 = sphi %s2345_s24, %s2981_s24  }
   0x5   : > { %s2370_s30 = sadd.s32 1, %s2296_s27   ;;  %s180_s8 = sadd.s32 1, %s2292_s26 }
   0x6   : > { %s177_s9 = ssub.s32 %s2296_s27, %s2370_s30  ;;  %p190_p0 = scmp.ne.s32.totalorder %s2292_s26, %s2288_s25 }
   0x7   : > { %p178_p1 = scmp.eq.s32.totalorder %s177_s9, 0  ;;  %p191_p2 = scmp.eq.s32.totalorder %s2366_s28, 1 }
   0x8   : > { %p196_p3 = scmp.ne.s32.totalorder %s2288_s25, %s2284_s24  ;;  %p197_p4 = scmp.eq.s32.totalorder %s1944_s29, 1 }
   0x9   : > { %s2381_s10 = scalar_select %p178_p1, %s2292_s26, %s180_s8  }
   0xa   : > { %p2383_p5 = por %p191_p2, %p190_p0  ;;  %p2387_p6 = por %p197_p4, %p196_p3 }
   0xb   : > { %p1945_p7 = scmp.ge.s32.totalorder %s2296_s27, 1  ;;  %p204_p8 = scmp.lt.s32.totalorder %s2296_s27, 3 }
   0xc   : > { %s2972_s11 = scalar_select %p2383_p5, 1, 0 }
   0xd   : > { %s2973_s12 = scalar_select %p2387_p6, 1, 0 }
   0xe   : > { %p2969_p9 = scmp.eq.s32.totalorder %s2366_s28, 0  ;;  %p2394_p10 = pnand %p1945_p7, %p204_p8 }
   0xf   : > { %s2298_s14 = smov [#allocation2]   ;;  %s2202_s19 = scalar_lea.hbm %s2966_s5, 8192 }
  0x10   : > { %s2974_s13 = scalar_select %p2394_p10, 1, 0 }
  0x11   : > { %s228_s15 = sshll.u32 %s2298_s14, 4  ;;  %p2137_p11 = pneg %p2394_p10  ;;  %s229_s15 = int_to_ptr.vmem [resolvable:$true] %s228_s15 }
  0x12   : > { %p2203_p13 = scmp.ne.s32.totalorder %s2966_s5, %s2202_s19  ;;  %p2209_p3 = scmp.lt.u32.totalorder %s2202_s19, %s2966_s5 }
  0x13   : > { %p2402_p12 = pnand %p2969_p9, %p2137_p11 }
  0x15   : > { %p2204_p0 = pneg %p2402_p12 }
  0x17   : > { %p2205_p1 = pnand %p2204_p0, %p2203_p13 }
  0x19   : > { %p2206_p2 = pneg %p2205_p1 }
  0x1b   : > { %p2211_p4 = pnand %p2209_p3, %p2206_p2 }
  0x1d   : > { %2214 = shalt.err (!%p2211_p4)
}
  0x1e   : > { %s2215_s29 = scalar_lea.vmem %s229_s15, 8192  ;;  %p2223_p9 = scmp.lt.s32.totalorder %s229_s15, %s229_s15 }
  0x1f   : > { %p2216_p7 = scmp.ne.s32.totalorder %s229_s15, %s2215_s29  ;;  %p2224_p6 = scmp.lt.s32.totalorder %s2215_s29, %s2215_s29 }
  0x21   : > { %p2218_p8 = pnand %p2216_p7, %p2204_p0  ;;  %p2225_p5 = por %p2224_p6, %p2223_p9 }
  0x23   : > { %p2219_p11 = pneg %p2218_p8 }
  0x25   : > { %p2226_p10 = pnand %p2225_p5, %p2219_p11 }
  0x27   : > { %2229 = shalt.err (!%p2226_p10)
}
  0x28   : > { %s2299_s8 = smov 512   ;;  %s2300_s9 = smov 32  }
  0x29   : > { %2140 = dma.hbm_to_vmem [thread:$0]  (!%p2402_p12), %s2966_s5, 8192, %s229_s15, [#allocation3], %s2299_s8, %s2299_s8, %s2300_s9  }
  0x2a   : > { %p2976_p13 = scmp.ne.s32.totalorder %s2974_s13, 0 }
  0x2b   : > { %p2977_p1 = scmp.eq.s32.totalorder (!%p2976_p13), %s2366_s28, 0 }
  0x2c   : > { %256 = sbr.rel (%p2976_p13) target bundleno = 866 (0x362), region = 48 }
  0x33   : > { %2275 = dma.done.wait (%p2977_p1), [#allocation3], 8192   ;;  %p2978_p0 = pmov %p2977_p1 }
  0x34   : > { %s1951_s18 = sshll.u32 %s2366_s28, 4  ;;  %v2186_v0 = vld [vmem:[%s2962_s1] sm:$0xff]   ;;  %v2187_v1 = vld [vmem:[%s2962_s1 + $0x8] sm:$0xff]   ;;  %v2188_v2 = vld [vmem:[%s2962_s1 + $0x10] sm:$0xff]   ;;  %vm391_vm0 = vcmask 523264   ;;  %s285_s17 = sand.u32 1, %s2288_s25  }
  0x35   : > { %2277 = vsyncadd (%p2978_p0), [#allocation3], 4294959104  ;;  %p289_p5 = scmp.lt.s32.totalorder %s1951_s18, 31  ;;  %2083 = vmatprep.subr.bf16.mxu0 %v2186_v0  ;;  %v2189_v4 = vld [vmem:[%s2962_s1 + $0x18] sm:$0xff]   ;;  %v2198_v6 = vld [vmem:[%s2964_s3] sm:$0xff]   ;;  %s2058_s20 = sshll.u32 %s2366_s28, 14 }
  0x36   : > { %2084 = vmatpush3.bf16.msra.mxu0 %v2186_v0  ;;  %v2199_v7 = vld [vmem:[%s2964_s3 + $0x8] sm:$0xff]   ;;  %2107 = vmatprep.subr.bf16.mxu1 %v2198_v6  ;;  %v2200_v14 = vld [vmem:[%s2964_s3 + $0x10] sm:$0xff]   ;;  %v2201_v15 = vld [vmem:[%s2964_s3 + $0x18] sm:$0xff]   ;;  %s2908_s15 = scalar_lea.hbm %s2968_s7, %s2058_s20  ;;  %s2920_s13 = scalar_lea.sflag [#allocation4], %s285_s17 }
  0x37   : > { %s2986_s18 = smov (!%p289_p5, %s1951_s18), 31  ;;  %2085 = vmatprep.subr.bf16.mxu0 %v2187_v1  ;;  %2108 = vmatpush3.bf16.msra.mxu1 %v2198_v6  ;;  %v721_v16 = vld [vmem:[#allocation2] sm:$0xff]  ;;  %v2474_v18 = vld [vmem:[#allocation2 + $0x8] sm:$0xff]  ;;  %p2979_p9 = scmp.ne.s32.totalorder %s2972_s11, 0 }
  0x38   : > { %s1952_s19 = sshll.u32 %s2986_s18, 2  ;;  %2109 = vmatprep.subr.bf16.mxu1 %v2199_v7  ;;  %v725_v17 = vld [vmem:[#allocation2 + $0x20] sm:$0xff]  ;;  %v2476_v21 = vld [vmem:[#allocation2 + $0x28] sm:$0xff]  ;;  %s1950_s18 = sshll.u32 %s285_s17, 10 }
  0x39   : > { %s2438_s23 = scalar_lea.vmem %s2961_s0, %s1952_s19  ;;  %v1987_v19 = vcombine.low %v721_v16, %v725_v17  ;;  %v1988_v20 = vcombine.high %v721_v16, %v725_v17  ;;  %v729_v22 = vld [vmem:[#allocation2 + $0x40] sm:$0xff]  ;;  %v1989_v24 = vcombine.low %v2474_v18, %v2476_v21  ;;  %v1990_v25 = vcombine.high %v2474_v18, %v2476_v21  ;;  %v730_v57 = vld [vmem:[#allocation2 + $0x48] sm:$0xff]  ;;  %s2643_s19 = scalar_lea.vmem [#allocation5], %s1950_s18 }
  0x3a   : > { %v2190_v3 = vld [vmem:[%s2438_s23] sm:$0xff]   ;;  %2086 = vmatpush3.bf16.msra.mxu0 %v2187_v1  ;;  %v2191_v5 = vld [vmem:[%s2438_s23 + $0x8] sm:$0xff]   ;;  %v2192_v8 = vld [vmem:[%s2438_s23 + $0x10] sm:$0xff]   ;;  %s1870_s16 = sshll.u32 %s2643_s19, 4  ;;  %s2910_s16 = int_to_ptr.vmem [resolvable:$true] %s1870_s16 }
  0x3b   : > { %2091 = vmatprep.mubr.msk.bf16.mxu0 %vm391_vm0, %v2190_v3  ;;  %2087 = vmatprep.subr.bf16.mxu0 %v2188_v2  ;;  %v2193_v9 = vld [vmem:[%s2438_s23 + $0x18] sm:$0xff]   ;;  %v2194_v10 = vld [vmem:[%s2438_s23 + $0x20] sm:$0xff]   ;;  %v2195_v11 = vld [vmem:[%s2438_s23 + $0x28] sm:$0xff]   ;;  %s2230_s22 = scalar_lea.vmem %s2910_s16, 16384 }
  0x3c   : > { %2110 = vmatpush3.bf16.msra.mxu1 %v2199_v7  ;;  %v2196_v12 = vld [vmem:[%s2438_s23 + $0x30] sm:$0xff]   ;;  %v2197_v13 = vld [vmem:[%s2438_s23 + $0x38] sm:$0xff]   ;;  %v733_v23 = vld [vmem:[#allocation2 + $0x60] sm:$0xff]  ;;  %p2231_p6 = scmp.ne.s32.totalorder %s2910_s16, %s2230_s22  ;;  %s2302_s23 = smov [#allocation5]  }
  0x3d   : > { %2111 = vmatprep.subr.bf16.mxu1 %v2200_v14  ;;  %v1996_v26 = vcombine.high %v729_v22, %v733_v23  ;;  %v737_v27 = vld [vmem:[#allocation2 + $0x80] sm:$0xff]  ;;  %v1995_v29 = vcombine.low %v729_v22, %v733_v23  ;;  %v734_v58 = vld [vmem:[#allocation2 + $0x68] sm:$0xff]  ;;  %s2234_s29 = sshll.u32 %s2302_s23, 4  ;;  %s2235_s29 = int_to_ptr.vmem [resolvable:$false] %s2234_s29 }
  0x3e   : > { %2088 = vmatpush3.bf16.msra.mxu0 %v2188_v2  ;;  %v741_v28 = vld [vmem:[#allocation2 + $0xa0] sm:$0xff]  ;;  %v1998_v0 = vcombine.high %v730_v57, %v734_v58  ;;  %v738_v3 = vld [vmem:[#allocation2 + $0x88] sm:$0xff]  ;;  %p2232_p10 = pnand %p2231_p6, %p2979_p9  ;;  %s2236_s8 = scalar_lea.vmem %s2235_s29, 32768 }
  0x3f   : > { %2089 = vmatprep.subr.bf16.mxu0 %v2189_v4  ;;  %v2004_v30 = vcombine.high %v737_v27, %v741_v28  ;;  %v745_v31 = vld [vmem:[#allocation2 + $0xc0] sm:$0xff]  ;;  %v2003_v33 = vcombine.low %v737_v27, %v741_v28  ;;  %p2237_p2 = scmp.lt.s32.totalorder %s2910_s16, %s2235_s29  ;;  %p2238_p3 = scmp.lt.s32.totalorder %s2236_s8, %s2230_s22 }
  0x40   : > { %2112 = vmatpush3.bf16.msra.mxu1 %v2200_v14  ;;  %v749_v32 = vld [vmem:[#allocation2 + $0xe0] sm:$0xff]  ;;  %v746_v14 = vld [vmem:[#allocation2 + $0xc8] sm:$0xff]  ;;  %p2233_p12 = pneg %p2232_p10 }
  0x41   : > { %2113 = vmatprep.subr.bf16.mxu1 %v2201_v15  ;;  %v2012_v34 = vcombine.high %v745_v31, %v749_v32  ;;  %v753_v35 = vld [vmem:[#allocation2 + $0x100] sm:$0xff]  ;;  %v2011_v37 = vcombine.low %v745_v31, %v749_v32  ;;  %p2239_p4 = por %p2238_p3, %p2237_p2 }
  0x42   : > { %2090 = vmatpush3.bf16.msra.mxu0 %v2189_v4  ;;  %v757_v36 = vld [vmem:[#allocation2 + $0x120] sm:$0xff]  ;;  %v742_v4 = vld [vmem:[#allocation2 + $0xa8] sm:$0xff] }
  0x43   : > { %1147 = vmatprep.subr.bf16.mxu0 %v1988_v20  ;;  %v2020_v38 = vcombine.high %v753_v35, %v757_v36  ;;  %v761_v39 = vld [vmem:[#allocation2 + $0x140] sm:$0xff]  ;;  %v2019_v41 = vcombine.low %v753_v35, %v757_v36  ;;  %v2005_v20 = vcombine.low %v738_v3, %v742_v4  ;;  %v762_v36 = vld [vmem:[#allocation2 + $0x148] sm:$0xff]  ;;  %p2240_p7 = pnand %p2239_p4, %p2233_p12 }
  0x44   : > { %2114 = vmatpush3.bf16.msra.mxu1 %v2201_v15  ;;  %v765_v40 = vld [vmem:[#allocation2 + $0x160] sm:$0xff]  ;;  %v750_v15 = vld [vmem:[#allocation2 + $0xe8] sm:$0xff] }
  0x45   : > { %2092 = vmatmul.mubr.msk.bf16.vlgmr.msra.gmra.mrb[0].mxu0 %vm391_vm0, %v2191_v5  ;;  %1260 = vmatprep.subr.bf16.mxu1 %v1990_v25  ;;  %v2028_v42 = vcombine.high %v761_v39, %v765_v40  ;;  %v2027_v43 = vcombine.low %v761_v39, %v765_v40  ;;  %v2485_v44 = vld [vmem:[%s2963_s2] ss:$0 sm:$0xff]  ;;  %v2014_v25 = vcombine.high %v746_v14, %v750_v15 }
  0x46   : > { %2095 = vmatprep.mubr.msk.bf16.mxu0 %vm391_vm0, %v2192_v8  ;;  %1148 = vmatpush1.bf16.msra.mxu0 %v1987_v19  ;;  %v2013_v32 = vcombine.low %v746_v14, %v750_v15  ;;  %v728_v15 = vld [vmem:[#allocation2 + $0x38] sm:$0xff] }
  0x47   : > { %1149 = vmatprep.subr.bf16.mxu0 %v1996_v26  ;;  %v758_v26 = vld [vmem:[#allocation2 + $0x128] sm:$0xff] }
  0x4a   : > { %1150 = vmatpush1.bf16.msra.mxu0 %v1995_v29 }
  0x4b   : > { %1151 = vmatprep.subr.bf16.mxu0 %v2004_v30 }
  0x4d   : > { %2096 = vmatmul.mubr.msk.bf16.gmra.mrb[4].mxu0 %vm391_vm0, %v2193_v9 }
  0x4e   : > { %2099 = vmatprep.mubr.msk.bf16.mxu0 %vm391_vm0, %v2194_v10  ;;  %1152 = vmatpush1.bf16.msra.mxu0 %v2003_v33  ;;  %v1997_v10 = vcombine.low %v730_v57, %v734_v58  ;;  %v769_v58 = vld [vmem:[#allocation2 + $0x180] sm:$0xff] }
  0x4f   : > { %1153 = vmatprep.subr.bf16.mxu0 %v2012_v34 }
  0x52   : > { %1154 = vmatpush1.bf16.msra.mxu0 %v2011_v37  ;;  %v766_v37 = vld [vmem:[#allocation2 + $0x168] sm:$0xff] }
  0x53   : > { %1155 = vmatprep.subr.bf16.mxu0 %v2020_v38 }
  0x55   : > { %2100 = vmatmul.mubr.msk.bf16.gmra.mrb[8].mxu0 %vm391_vm0, %v2195_v11 }
  0x56   : > { %2103 = vmatprep.mubr.msk.bf16.mxu0 %vm391_vm0, %v2196_v12  ;;  %1156 = vmatpush1.bf16.msra.mxu0 %v2019_v41  ;;  %v2006_v12 = vcombine.high %v738_v3, %v742_v4  ;;  %v778_v3 = vld [vmem:[#allocation2 + $0x1c8] sm:$0xff] }
  0x57   : > { %1157 = vmatprep.subr.bf16.mxu0 %v2028_v42 }
  0x5a   : > { %1158 = vmatpush1.bf16.msra.mxu0 %v2027_v43 }
  0x5d   : > { %2104 = vmatmul.mubr.msk.bf16.gmra.mrb[12].mxu0 %vm391_vm0, %v2197_v13 }
 0x118   : > { %v2093_v45 = vpop.f32.mrb[0].mxu0 }
 0x119   : > { %v459_v46 = vadd.f32 %v2093_v45, %v2485_v44  ;;  %v450_v47 = vpop.f32.mrb[1].mxu0  ;;  %v2030_v45 = vcombine.high %v762_v36, %v766_v37 }
 0x11a   : > { %v451_v48 = vadd.f32 %v2485_v44, %v450_v47  ;;  %v2094_v49 = vpop.f32.mrb[2].mxu0 }
 0x11b   : > { %v462_v50 = vadd.f32 %v2094_v49, %v2485_v44  ;;  %v453_v51 = vpop.f32.mrb[3].mxu0  ;;  %v515_v53 = vmax.f32 %v459_v46, 0.0 }
 0x11c   : > { %v454_v52 = vadd.f32 %v2485_v44, %v453_v51  ;;  %v513_v55 = vmax.f32 %v451_v48, 0.0 }
 0x11d   : > { %v516_v54 = vmax.f32 %v462_v50, 0.0 }
 0x11e   : > { %v514_v56 = vmax.f32 %v454_v52, 0.0 }
 0x11f   : > { %v530_v59 = vpack.c.bf16 %v516_v54, %v515_v53  ;;  %v2029_v53 = vcombine.low %v762_v36, %v766_v37 }
 0x120   : > { %v2097_v60 = vpop.f32.mrb[4].mxu0  ;;  %v529_v61 = vpack.c.bf16 %v514_v56, %v513_v55 }
 0x121   : > { %v475_v62 = vadd.f32 %v2097_v60, %v2485_v44  ;;  %v466_v63 = vpop.f32.mrb[5].mxu0  ;;  %v770_v60 = vld [vmem:[#allocation2 + $0x188] sm:$0xff] }
 0x122   : > { %v467_v1 = vadd.f32 %v2485_v44, %v466_v63  ;;  %2115 = vmatprep.mubr.msk.bf16.mxu1 %vm391_vm0, %v529_v61  ;;  %v2098_v2 = vpop.f32.mrb[6].mxu0 }
 0x123   : > { %v519_v5 = vmax.f32 %v475_v62, 0.0  ;;  %v478_v6 = vadd.f32 %v2098_v2, %v2485_v44  ;;  %2116 = vmatmul.mubr.msk.bf16.vlgmr.msra.gmra.mrb[0].mxu1 %vm391_vm0, %v530_v59  ;;  %v469_v7 = vpop.f32.mrb[7].mxu0  ;;  %v773_v59 = vld [vmem:[#allocation2 + $0x1a0] sm:$0xff]  ;;  %v774_v62 = vld [vmem:[#allocation2 + $0x1a8] sm:$0xff] }
 0x124   : > { %v517_v8 = vmax.f32 %v467_v1, 0.0  ;;  %v470_v9 = vadd.f32 %v2485_v44, %v469_v7  ;;  %1261 = vmatpush1.bf16.msra.mxu1 %v1989_v24  ;;  %v754_v24 = vld [vmem:[#allocation2 + $0x108] sm:$0xff]  ;;  %v2036_v61 = vcombine.high %v769_v58, %v773_v59  ;;  %v2035_v63 = vcombine.low %v769_v58, %v773_v59  ;;  %v777_v1 = vld [vmem:[#allocation2 + $0x1c0] sm:$0xff]  ;;  %v747_v59 = vld [vmem:[#allocation2 + $0xd0] sm:$0xff] }
 0x125   : > { %v520_v11 = vmax.f32 %v478_v6, 0.0  ;;  %1262 = vmatprep.subr.bf16.mxu1 %v1998_v0  ;;  %v2022_v34 = vcombine.high %v754_v24, %v758_v26  ;;  %v2021_v41 = vcombine.low %v754_v24, %v758_v26  ;;  %v2037_v0 = vcombine.low %v770_v60, %v774_v62  ;;  %v781_v2 = vld [vmem:[#allocation2 + $0x1e0] sm:$0xff] }
 0x126   : > { %v518_v13 = vmax.f32 %v470_v9, 0.0  ;;  %1159 = vmatprep.subr.bf16.mxu0 %v2036_v61  ;;  %v2044_v4 = vcombine.high %v777_v1, %v781_v2  ;;  %v2043_v6 = vcombine.low %v777_v1, %v781_v2  ;;  %v2301_v9 = vmov 0   ;;  %v751_v61 = vld [vmem:[#allocation2 + $0xf0] sm:$0xff] }
 0x127   : > { %v532_v16 = vpack.c.bf16 %v520_v11, %v519_v5  ;;  %1160 = vmatpush1.bf16.msra.mxu0 %v2035_v63  ;;  %v782_v5 = vld [vmem:[#allocation2 + $0x1e8] sm:$0xff]  ;;  %1179 = vmatprep.mubr.bf16.mxu0 %v2301_v9  ;;  %v727_v11 = vld [vmem:[#allocation2 + $0x30] sm:$0xff]  ;;  %v752_v63 = vld [vmem:[#allocation2 + $0xf8] sm:$0xff] }
 0x128   : > { %v531_v17 = vpack.c.bf16 %v518_v13, %v517_v8  ;;  %v2101_v19 = vpop.f32.mrb[8].mxu0  ;;  %1263 = vmatpush1.bf16.msra.mxu1 %v1997_v10  ;;  %v2045_v7 = vcombine.low %v778_v3, %v782_v5  ;;  %v2046_v8 = vcombine.high %v778_v3, %v782_v5  ;;  %1161 = vmatprep.subr.bf16.mxu0 %v2044_v4  ;;  %v723_v10 = vld [vmem:[#allocation2 + $0x10] sm:$0xff] }
 0x129   : > { %v491_v22 = vadd.f32 %v2101_v19, %v2485_v44  ;;  %v482_v23 = vpop.f32.mrb[9].mxu0  ;;  %1264 = vmatprep.subr.bf16.mxu1 %v2006_v12  ;;  %v724_v12 = vld [vmem:[#allocation2 + $0x18] sm:$0xff]  ;;  %v1991_v13 = vcombine.low %v723_v10, %v727_v11  ;;  %v1992_v14 = vcombine.high %v723_v10, %v727_v11  ;;  %v2519_v19 = vld [vmem:[%s2965_s4] ss:$0 sm:$0xff] }
 0x12a   : > { %2119 = vmatprep.mubr.msk.bf16.mxu1 %vm391_vm0, %v531_v17  ;;  %v483_v18 = vadd.f32 %v2485_v44, %v482_v23  ;;  %v2102_v21 = vpop.f32.mrb[10].mxu0  ;;  %v1994_v17 = vcombine.high %v724_v12, %v728_v15 }
 0x12b   : > { %2120 = vmatmul.mubr.msk.bf16.gmra.mrb[4].mxu1 %vm391_vm0, %v532_v16  ;;  %v523_v27 = vmax.f32 %v491_v22, 0.0  ;;  %v494_v28 = vadd.f32 %v2102_v21, %v2485_v44  ;;  %v485_v29 = vpop.f32.mrb[11].mxu0  ;;  %1162 = vmatpush1.bf16.msra.mxu0 %v2043_v6  ;;  %v1993_v16 = vcombine.low %v724_v12, %v728_v15  ;;  %v2016_v6 = vcombine.high %v747_v59, %v751_v61  ;;  %v759_v12 = vld [vmem:[#allocation2 + $0x130] sm:$0xff] }
 0x12c   : > { %v521_v30 = vmax.f32 %v483_v18, 0.0  ;;  %v486_v31 = vadd.f32 %v2485_v44, %v485_v29  ;;  %1265 = vmatpush1.bf16.msra.mxu1 %v2005_v20  ;;  %1373 = vmatprep.subr.bf16.mxu0 %v1992_v14  ;;  %v731_v29 = vld [vmem:[#allocation2 + $0x50] sm:$0xff]  ;;  %v760_v14 = vld [vmem:[#allocation2 + $0x138] sm:$0xff] }
 0x12d   : > { %v524_v33 = vmax.f32 %v494_v28, 0.0  ;;  %1266 = vmatprep.subr.bf16.mxu1 %v2014_v25 }
 0x12e   : > { %v522_v35 = vmax.f32 %v486_v31, 0.0 }
 0x12f   : > { %v534_v38 = vpack.c.bf16 %v524_v33, %v523_v27  ;;  %v732_v33 = vld [vmem:[#allocation2 + $0x58] sm:$0xff] }
 0x130   : > { %v533_v39 = vpack.c.bf16 %v522_v35, %v521_v30  ;;  %v2105_v40 = vpop.f32.mrb[12].mxu0  ;;  %1267 = vmatpush1.bf16.msra.mxu1 %v2013_v32  ;;  %v735_v32 = vld [vmem:[#allocation2 + $0x70] sm:$0xff] }
 0x131   : > { %v507_v42 = vadd.f32 %v2105_v40, %v2485_v44  ;;  %v498_v43 = vpop.f32.mrb[13].mxu0  ;;  %1268 = vmatprep.subr.bf16.mxu1 %v2022_v34  ;;  %v736_v34 = vld [vmem:[#allocation2 + $0x78] sm:$0xff] }
 0x132   : > { %2123 = vmatprep.mubr.msk.bf16.mxu1 %vm391_vm0, %v533_v39  ;;  %v499_v46 = vadd.f32 %v2485_v44, %v498_v43  ;;  %v2106_v47 = vpop.f32.mrb[14].mxu0  ;;  %v743_v43 = vld [vmem:[#allocation2 + $0xb0] sm:$0xff] }
 0x133   : > { %2124 = vmatmul.mubr.msk.bf16.gmra.mrb[8].mxu1 %vm391_vm0, %v534_v38  ;;  %v527_v48 = vmax.f32 %v507_v42, 0.0  ;;  %v510_v49 = vadd.f32 %v2106_v47, %v2485_v44  ;;  %v501_v50 = vpop.f32.mrb[15].mxu0  ;;  %v739_v38 = vld [vmem:[#allocation2 + $0x90] sm:$0xff]  ;;  %v2002_v42 = vcombine.high %v732_v33, %v736_v34 }
 0x134   : > { %v525_v51 = vmax.f32 %v499_v46, 0.0  ;;  %v502_v52 = vadd.f32 %v2485_v44, %v501_v50  ;;  %1269 = vmatpush1.bf16.msra.mxu1 %v2021_v41  ;;  %v2038_v44 = vcombine.high %v770_v60, %v774_v62  ;;  %v2000_v41 = vcombine.high %v731_v29, %v735_v32  ;;  %v744_v46 = vld [vmem:[#allocation2 + $0xb8] sm:$0xff] }
 0x135   : > { %v528_v54 = vmax.f32 %v510_v49, 0.0  ;;  %1270 = vmatprep.subr.bf16.mxu1 %v2030_v45  ;;  %v740_v45 = vld [vmem:[#allocation2 + $0x98] sm:$0xff]  ;;  %v2007_v2 = vcombine.low %v739_v38, %v743_v43 }
 0x136   : > { %v526_v55 = vmax.f32 %v502_v52, 0.0  ;;  %v1999_v52 = vcombine.low %v731_v29, %v735_v32  ;;  %v748_v62 = vld [vmem:[#allocation2 + $0xd8] sm:$0xff]  ;;  %v2009_v3 = vcombine.low %v740_v45, %v744_v46 }
 0x137   : > { %v536_v56 = vpack.c.bf16 %v528_v54, %v527_v48  ;;  %v764_v29 = vld [vmem:[#allocation2 + $0x158] sm:$0xff] }
 0x138   : > { %v535_v57 = vpack.c.bf16 %v526_v55, %v525_v51  ;;  %1271 = vmatpush1.bf16.msra.mxu1 %v2029_v53  ;;  %v2001_v53 = vcombine.low %v732_v33, %v736_v34 }
 0x139   : > { %1272 = vmatprep.subr.bf16.mxu1 %v2038_v44 }
 0x13a   : > { %2127 = vmatprep.mubr.msk.bf16.mxu1 %vm391_vm0, %v535_v57  ;;  %v2010_v57 = vcombine.high %v740_v45, %v744_v46  ;;  %v775_v46 = vld [vmem:[#allocation2 + $0x1b0] sm:$0xff] }
 0x13b   : > { %2128 = vmatmul.mubr.msk.bf16.gmra.mrb[12].mxu1 %vm391_vm0, %v536_v56  ;;  %v2008_v56 = vcombine.high %v739_v38, %v743_v43 }
 0x13c   : > { %1273 = vmatpush1.bf16.msra.mxu1 %v2037_v0  ;;  %1292 = vmatprep.mubr.bf16.mxu1 %v2301_v9 }
 0x13d   : > { %1274 = vmatprep.subr.bf16.mxu1 %v2046_v8  ;;  %v755_v8 = vld [vmem:[#allocation2 + $0x110] sm:$0xff] }
 0x13e   : > { %v2023_v34 = vcombine.low %v755_v8, %v759_v12 }
 0x140   : > { %1275 = vmatpush1.bf16.msra.mxu1 %v2045_v7  ;;  %v2018_v7 = vcombine.high %v748_v62, %v752_v63 }
 0x141   : > { %1486 = vmatprep.subr.bf16.mxu1 %v1994_v17 }
 0x1f6   : > { %v2117_v20 = vpop.f32.mrb[0].mxu1 }
 0x1f7   : > { %v643_v22 = vadd.f32 %v2117_v20, %v2519_v19  ;;  %v634_v23 = vpop.f32.mrb[1].mxu1 }
 0x1f8   : > { %v635_v25 = vadd.f32 %v2519_v19, %v634_v23  ;;  %v2118_v18 = vpop.f32.mrb[2].mxu1  ;;  %v2015_v23 = vcombine.low %v747_v59, %v751_v61  ;;  %v779_v59 = vld [vmem:[#allocation2 + $0x1d0] sm:$0xff] }
 0x1f9   : > { %v646_v21 = vadd.f32 %v2118_v18, %v2519_v19  ;;  %v637_v24 = vpop.f32.mrb[3].mxu1  ;;  %v699_v27 = vmax.f32 %v643_v22, 0.0  ;;  %v783_v61 = vld [vmem:[#allocation2 + $0x1f0] sm:$0xff] }
 0x1fa   : > { %v638_v26 = vadd.f32 %v2519_v19, %v637_v24  ;;  %v697_v30 = vmax.f32 %v635_v25, 0.0  ;;  %v2017_v25 = vcombine.low %v748_v62, %v752_v63  ;;  %v780_v62 = vld [vmem:[#allocation2 + $0x1d8] sm:$0xff] }
 0x1fb   : > { %v700_v28 = vmax.f32 %v646_v21, 0.0  ;;  %v2024_v21 = vcombine.high %v755_v8, %v759_v12  ;;  %v784_v63 = vld [vmem:[#allocation2 + $0x1f8] sm:$0xff]  ;;  %v2616_v8 = vld [vmem:[%s2967_s6] sm:$0xff] }
 0x1fc   : > { %v698_v31 = vmax.f32 %v638_v26, 0.0  ;;  %v763_v26 = vld [vmem:[#allocation2 + $0x150] sm:$0xff] }
 0x1fd   : > { %v2525_v35 = vpack.c.bf16 %v700_v28, %v699_v27  ;;  %v767_v28 = vld [vmem:[#allocation2 + $0x170] sm:$0xff] }
 0x1fe   : > { %v2527_v36 = vpack.c.bf16 %v698_v31, %v697_v30  ;;  %v2121_v37 = vpop.f32.mrb[4].mxu1  ;;  %v768_v30 = vld [vmem:[#allocation2 + $0x178] sm:$0xff] }
 0x1ff   : > { %v659_v39 = vadd.f32 %v2121_v37, %v2519_v19  ;;  %v650_v40 = vpop.f32.mrb[5].mxu1 }
 0x200   : > { %v651_v47 = vadd.f32 %v2519_v19, %v650_v40  ;;  %1180 = vmatmul.mubr.bf16.vlgmr.msra.gmra.mrb[16].mxu0 %v2527_v36  ;;  %1293 = vmatmul.mubr.bf16.vlgmr.msra.gmra.mrb[16].mxu1 %v2527_v36  ;;  %v2122_v48 = vpop.f32.mrb[6].mxu1  ;;  %v2032_v40 = vcombine.high %v763_v26, %v767_v28 }
 0x201   : > { %v703_v49 = vmax.f32 %v659_v39, 0.0  ;;  %1374 = vmatpush1.bf16.msra.mxu0 %v1991_v13  ;;  %1487 = vmatpush1.bf16.msra.mxu1 %v1993_v16  ;;  %v662_v50 = vadd.f32 %v2122_v48, %v2519_v19  ;;  %v653_v51 = vpop.f32.mrb[7].mxu1  ;;  %v756_v13 = vld [vmem:[#allocation2 + $0x118] sm:$0xff] }
 0x202   : > { %v701_v54 = vmax.f32 %v651_v47, 0.0  ;;  %v654_v55 = vadd.f32 %v2519_v19, %v653_v51  ;;  %1189 = vmatprep.mubr.bf16.mxu0 %v2301_v9  ;;  %1302 = vmatprep.mubr.bf16.mxu1 %v2301_v9  ;;  %v2026_v24 = vcombine.high %v756_v13, %v760_v14  ;;  %v2025_v37 = vcombine.low %v756_v13, %v760_v14  ;;  %v772_v47 = vld [vmem:[#allocation2 + $0x198] sm:$0xff] }
 0x203   : > { %v704_v58 = vmax.f32 %v662_v50, 0.0  ;;  %1375 = vmatprep.subr.bf16.mxu0 %v2000_v41  ;;  %1488 = vmatprep.subr.bf16.mxu1 %v2002_v42  ;;  %v2034_v41 = vcombine.high %v764_v29, %v768_v30  ;;  %v771_v42 = vld [vmem:[#allocation2 + $0x190] sm:$0xff]  ;;  %v776_v48 = vld [vmem:[#allocation2 + $0x1b8] sm:$0xff] }
 0x204   : > { %v702_v60 = vmax.f32 %v654_v55, 0.0  ;;  %v2033_v55 = vcombine.low %v764_v29, %v768_v30 }
 0x205   : > { %v2537_v0 = vpack.c.bf16 %v704_v58, %v703_v49  ;;  %1376 = vmatpush1.bf16.msra.mxu0 %v1999_v52  ;;  %1489 = vmatpush1.bf16.msra.mxu1 %v2001_v53  ;;  %v2042_v58 = vcombine.high %v772_v47, %v776_v48 }
 0x206   : > { %v2539_v44 = vpack.c.bf16 %v702_v60, %v701_v54  ;;  %v2125_v1 = vpop.f32.mrb[8].mxu1  ;;  %1377 = vmatprep.subr.bf16.mxu0 %v2008_v56  ;;  %1490 = vmatprep.subr.bf16.mxu1 %v2010_v57  ;;  %v2031_v54 = vcombine.low %v763_v26, %v767_v28  ;;  %v2040_v57 = vcombine.high %v771_v42, %v775_v46 }
 0x207   : > { %v675_v4 = vadd.f32 %v2125_v1, %v2519_v19  ;;  %v666_v5 = vpop.f32.mrb[9].mxu1 }
 0x208   : > { %1190 = vmatmul.mubr.bf16.gmra.mrb[20].mxu0 %v2525_v35  ;;  %1303 = vmatmul.mubr.bf16.gmra.mrb[20].mxu1 %v2525_v35  ;;  %v667_v10 = vadd.f32 %v2519_v19, %v666_v5  ;;  %v2126_v11 = vpop.f32.mrb[10].mxu1  ;;  %v2050_v5 = vcombine.high %v780_v62, %v784_v63 }
 0x209   : > { %v707_v15 = vmax.f32 %v675_v4, 0.0  ;;  %1199 = vmatprep.mubr.bf16.mxu0 %v2301_v9  ;;  %1312 = vmatprep.mubr.bf16.mxu1 %v2301_v9  ;;  %v678_v16 = vadd.f32 %v2126_v11, %v2519_v19  ;;  %v669_v17 = vpop.f32.mrb[11].mxu1  ;;  %v2041_v4 = vcombine.low %v772_v47, %v776_v48 }
 0x20a   : > { %v705_v20 = vmax.f32 %v667_v10, 0.0  ;;  %1378 = vmatpush1.bf16.msra.mxu0 %v2007_v2  ;;  %1491 = vmatpush1.bf16.msra.mxu1 %v2009_v3  ;;  %v670_v22 = vadd.f32 %v2519_v19, %v669_v17  ;;  %v2039_v3 = vcombine.low %v771_v42, %v775_v46 }
 0x20b   : > { %v708_v18 = vmax.f32 %v678_v16, 0.0  ;;  %1379 = vmatprep.subr.bf16.mxu0 %v2016_v6  ;;  %1492 = vmatprep.subr.bf16.mxu1 %v2018_v7  ;;  %v2047_v6 = vcombine.low %v779_v59, %v783_v61  ;;  %v2049_v7 = vcombine.low %v780_v62, %v784_v63 }
 0x20c   : > { %v706_v27 = vmax.f32 %v670_v22, 0.0 }
 0x20d   : > { %v2549_v31 = vpack.c.bf16 %v708_v18, %v707_v15 }
 0x20e   : > { %v2551_v32 = vpack.c.bf16 %v706_v27, %v705_v20  ;;  %1380 = vmatpush1.bf16.msra.mxu0 %v2015_v23  ;;  %1493 = vmatpush1.bf16.msra.mxu1 %v2017_v25  ;;  %v2129_v33 = vpop.f32.mrb[12].mxu1 }
 0x20f   : > { %v691_v38 = vadd.f32 %v2129_v33, %v2519_v19  ;;  %1381 = vmatprep.subr.bf16.mxu0 %v2024_v21  ;;  %1494 = vmatprep.subr.bf16.mxu1 %v2026_v24  ;;  %v682_v39 = vpop.f32.mrb[13].mxu1 }
 0x210   : > { %1200 = vmatmul.mubr.bf16.gmra.mrb[24].mxu0 %v2539_v44  ;;  %1313 = vmatmul.mubr.bf16.gmra.mrb[24].mxu1 %v2539_v44  ;;  %v683_v43 = vadd.f32 %v2519_v19, %v682_v39  ;;  %v2130_v45 = vpop.f32.mrb[14].mxu1 }
 0x211   : > { %1209 = vmatprep.mubr.bf16.mxu0 %v2301_v9  ;;  %1322 = vmatprep.mubr.bf16.mxu1 %v2301_v9  ;;  %v711_v49 = vmax.f32 %v691_v38, 0.0  ;;  %v694_v50 = vadd.f32 %v2130_v45, %v2519_v19  ;;  %v685_v51 = vpop.f32.mrb[15].mxu1 }
 0x212   : > { %v709_v52 = vmax.f32 %v683_v43, 0.0  ;;  %1382 = vmatpush1.bf16.msra.mxu0 %v2023_v34  ;;  %1495 = vmatpush1.bf16.msra.mxu1 %v2025_v37  ;;  %v686_v53 = vadd.f32 %v2519_v19, %v685_v51  ;;  %v2048_v19 = vcombine.high %v779_v59, %v783_v61 }
 0x213   : > { %v712_v56 = vmax.f32 %v694_v50, 0.0  ;;  %1383 = vmatprep.subr.bf16.mxu0 %v2032_v40  ;;  %1496 = vmatprep.subr.bf16.mxu1 %v2034_v41 }
 0x214   : > { %v710_v60 = vmax.f32 %v686_v53, 0.0 }
 0x215   : > { %v2561_v1 = vpack.c.bf16 %v712_v56, %v711_v49 }
 0x216   : > { %v719_v2 = vpack.c.bf16 %v710_v60, %v709_v52  ;;  %1384 = vmatpush1.bf16.msra.mxu0 %v2031_v54  ;;  %1497 = vmatpush1.bf16.msra.mxu1 %v2033_v55 }
 0x217   : > { %1385 = vmatprep.subr.bf16.mxu0 %v2040_v57  ;;  %1498 = vmatprep.subr.bf16.mxu1 %v2042_v58 }
 0x218   : > { %1210 = vmatmul.mubr.bf16.gmra.mrb[28].mxu0 %v2537_v0  ;;  %1323 = vmatmul.mubr.bf16.gmra.mrb[28].mxu1 %v2537_v0 }
 0x219   : > { %1219 = vmatprep.mubr.bf16.mxu0 %v2301_v9  ;;  %1332 = vmatprep.mubr.bf16.mxu1 %v2301_v9 }
 0x21a   : > { %1386 = vmatpush1.bf16.msra.mxu0 %v2039_v3  ;;  %1499 = vmatpush1.bf16.msra.mxu1 %v2041_v4 }
 0x21b   : > { %1387 = vmatprep.subr.bf16.mxu0 %v2048_v19  ;;  %1500 = vmatprep.subr.bf16.mxu1 %v2050_v5 }
 0x21e   : > { %1388 = vmatpush1.bf16.msra.mxu0 %v2047_v6  ;;  %1501 = vmatpush1.bf16.msra.mxu1 %v2049_v7 }
 0x220   : > { %1220 = vmatmul.mubr.bf16.gmra.mrb[32].mxu0 %v2551_v32  ;;  %1333 = vmatmul.mubr.bf16.gmra.mrb[32].mxu1 %v2551_v32 }
 0x221   : > { %1229 = vmatprep.mubr.bf16.mxu0 %v2301_v9  ;;  %1342 = vmatprep.mubr.bf16.mxu1 %v2301_v9 }
 0x228   : > { %1230 = vmatmul.mubr.bf16.gmra.mrb[36].mxu0 %v2549_v31  ;;  %1343 = vmatmul.mubr.bf16.gmra.mrb[36].mxu1 %v2549_v31 }
 0x229   : > { %1239 = vmatprep.mubr.bf16.mxu0 %v2301_v9  ;;  %1352 = vmatprep.mubr.bf16.mxu1 %v2301_v9 }
 0x230   : > { %1240 = vmatmul.mubr.bf16.gmra.mrb[40].mxu0 %v719_v2  ;;  %1353 = vmatmul.mubr.bf16.gmra.mrb[40].mxu1 %v719_v2 }
 0x231   : > { %1249 = vmatprep.mubr.bf16.mxu0 %v2301_v9  ;;  %1362 = vmatprep.mubr.bf16.mxu1 %v2301_v9 }
 0x238   : > { %1250 = vmatmul.mubr.bf16.gmra.mrb[44].mxu0 %v2561_v1  ;;  %1363 = vmatmul.mubr.bf16.gmra.mrb[44].mxu1 %v2561_v1 }
 0x239   : > { %1405 = vmatprep.mubr.bf16.mxu0 %v2301_v9  ;;  %1518 = vmatprep.mubr.bf16.mxu1 %v2301_v9 }
 0x240   : > { %1406 = vmatmul.mubr.bf16.vlgmr.msra.gmra.mrb[48].mxu0 %v2527_v36  ;;  %1519 = vmatmul.mubr.bf16.vlgmr.msra.gmra.mrb[48].mxu1 %v2527_v36 }
 0x241   : > { %1415 = vmatprep.mubr.bf16.mxu0 %v2301_v9  ;;  %1528 = vmatprep.mubr.bf16.mxu1 %v2301_v9 }
 0x248   : > { %1416 = vmatmul.mubr.bf16.gmra.mrb[52].mxu0 %v2525_v35  ;;  %1529 = vmatmul.mubr.bf16.gmra.mrb[52].mxu1 %v2525_v35  ;;  %v787_v35 = vlaneseq }
 0x249   : > { %1425 = vmatprep.mubr.bf16.mxu0 %v2301_v9  ;;  %1538 = vmatprep.mubr.bf16.mxu1 %v2301_v9 }
 0x24a   : > { %v2609_v36 = vshrl.u32 %v787_v35, 7 }
 0x24c   : > { %v793_v10 = vsub.s32 1, %v2609_v36 }
 0x24e   : > { %v2628_v13 = vrot.slane %v2616_v8, %v793_v10 }
 0x250   : > { %1426 = vmatmul.mubr.bf16.gmra.mrb[56].mxu0 %v2539_v44  ;;  %1539 = vmatmul.mubr.bf16.gmra.mrb[56].mxu1 %v2539_v44  ;;  %v797_v44 = vsub.s32 2, %v2609_v36 }
 0x251   : > { %1435 = vmatprep.mubr.bf16.mxu0 %v2301_v9  ;;  %1548 = vmatprep.mubr.bf16.mxu1 %v2301_v9 }
 0x252   : > { %v2625_v12 = vrot.slane %v2616_v8, %v797_v44 }
 0x258   : > { %1436 = vmatmul.mubr.bf16.gmra.mrb[60].mxu0 %v2537_v0  ;;  %1549 = vmatmul.mubr.bf16.gmra.mrb[60].mxu1 %v2537_v0  ;;  %v789_v0 = vsub.s32 0, %v2609_v36 }
 0x259   : > { %1445 = vmatprep.mubr.bf16.mxu0 %v2301_v9  ;;  %1558 = vmatprep.mubr.bf16.mxu1 %v2301_v9 }
 0x25a   : > { %v2622_v11 = vrot.slane %v2616_v8, %v789_v0 }
 0x260   : > { %1446 = vmatmul.mubr.bf16.gmra.mrb[64].mxu0 %v2551_v32  ;;  %1559 = vmatmul.mubr.bf16.gmra.mrb[64].mxu1 %v2551_v32 }
 0x261   : > { %1455 = vmatprep.mubr.bf16.mxu0 %v2301_v9  ;;  %1568 = vmatprep.mubr.bf16.mxu1 %v2301_v9 }
 0x268   : > { %1456 = vmatmul.mubr.bf16.gmra.mrb[68].mxu0 %v2549_v31  ;;  %1569 = vmatmul.mubr.bf16.gmra.mrb[68].mxu1 %v2549_v31 }
 0x269   : > { %1465 = vmatprep.mubr.bf16.mxu0 %v2301_v9  ;;  %1578 = vmatprep.mubr.bf16.mxu1 %v2301_v9 }
 0x270   : > { %1466 = vmatmul.mubr.bf16.gmra.mrb[72].mxu0 %v719_v2  ;;  %1579 = vmatmul.mubr.bf16.gmra.mrb[72].mxu1 %v719_v2 }
 0x271   : > { %1475 = vmatprep.mubr.bf16.mxu0 %v2301_v9  ;;  %1588 = vmatprep.mubr.bf16.mxu1 %v2301_v9  ;;  %v801_v9 = vsub.s32 3, %v2609_v36 }
 0x273   : > { %v2631_v14 = vrot.slane %v2616_v8, %v801_v9 }
 0x278   : > { %1476 = vmatmul.mubr.bf16.gmra.mrb[76].mxu0 %v2561_v1  ;;  %1589 = vmatmul.mubr.bf16.gmra.mrb[76].mxu1 %v2561_v1 }
 0x2d3   : > { %v1181_v15 = vpop.f32.mrb[16].mxu0  ;;  %v1294_v16 = vpop.f32.mrb[16].mxu1 }
 0x2d4   : > { %v1182_v17 = vadd.f32 %v1181_v15, %v2622_v11  ;;  %v1295_v20 = vadd.f32 %v1294_v16, %v2625_v12  ;;  %v1183_v22 = vpop.f32.mrb[17].mxu0  ;;  %v1296_v23 = vpop.f32.mrb[17].mxu1 }
 0x2d5   : > { %v1184_v25 = vadd.f32 %v1183_v22, %v2628_v13  ;;  %v1297_v18 = vadd.f32 %v1296_v23, %v2631_v14  ;;  %v1185_v21 = vpop.f32.mrb[18].mxu0  ;;  %v1298_v24 = vpop.f32.mrb[18].mxu1 }
 0x2d6   : > { %v1599_v26 = vmax.f32 %v1182_v17, 0.0  ;;  %v1601_v27 = vmax.f32 %v1295_v20, 0.0  ;;  %v1186_v28 = vadd.f32 %v1185_v21, %v2622_v11  ;;  %v1299_v29 = vadd.f32 %v1298_v24, %v2625_v12  ;;  %v1187_v30 = vpop.f32.mrb[19].mxu0  ;;  %v1300_v31 = vpop.f32.mrb[19].mxu1 }
 0x2d7   : > { %v1600_v32 = vmax.f32 %v1184_v25, 0.0  ;;  %v1602_v33 = vmax.f32 %v1297_v18, 0.0  ;;  %v1188_v34 = vadd.f32 %v1187_v30, %v2628_v13  ;;  %v1301_v37 = vadd.f32 %v1300_v31, %v2631_v14 }
 0x2d8   : > { %1727 = vst [vmem:[%s2643_s19] sm:$0xff] %v1599_v26  ;;  %1729 = vst [vmem:[%s2643_s19 + $0x10] sm:$0xff] %v1601_v27  ;;  %v1607_v38 = vmax.f32 %v1186_v28, 0.0  ;;  %v1609_v39 = vmax.f32 %v1299_v29, 0.0 }
 0x2d9   : > { %1728 = vst [vmem:[%s2643_s19 + $0x8] sm:$0xff] %v1600_v32  ;;  %1730 = vst [vmem:[%s2643_s19 + $0x18] sm:$0xff] %v1602_v33  ;;  %v1608_v40 = vmax.f32 %v1188_v34, 0.0  ;;  %v1610_v41 = vmax.f32 %v1301_v37, 0.0 }
 0x2da   : > { %1735 = vst [vmem:[%s2643_s19 + $0x40] sm:$0xff] %v1607_v38  ;;  %1737 = vst [vmem:[%s2643_s19 + $0x50] sm:$0xff] %v1609_v39 }
 0x2db   : > { %1736 = vst [vmem:[%s2643_s19 + $0x48] sm:$0xff] %v1608_v40  ;;  %1738 = vst [vmem:[%s2643_s19 + $0x58] sm:$0xff] %v1610_v41  ;;  %v1191_v42 = vpop.f32.mrb[20].mxu0  ;;  %v1304_v43 = vpop.f32.mrb[20].mxu1 }
 0x2dc   : > { %v1192_v45 = vadd.f32 %v1191_v42, %v2622_v11  ;;  %v1305_v46 = vadd.f32 %v1304_v43, %v2625_v12  ;;  %v1193_v47 = vpop.f32.mrb[21].mxu0  ;;  %v1306_v48 = vpop.f32.mrb[21].mxu1 }
 0x2dd   : > { %v1194_v49 = vadd.f32 %v1193_v47, %v2628_v13  ;;  %v1307_v50 = vadd.f32 %v1306_v48, %v2631_v14  ;;  %v1195_v51 = vpop.f32.mrb[22].mxu0  ;;  %v1308_v52 = vpop.f32.mrb[22].mxu1 }
 0x2de   : > { %v1615_v53 = vmax.f32 %v1192_v45, 0.0  ;;  %v1617_v54 = vmax.f32 %v1305_v46, 0.0  ;;  %v1196_v55 = vadd.f32 %v1195_v51, %v2622_v11  ;;  %v1309_v56 = vadd.f32 %v1308_v52, %v2625_v12  ;;  %v1197_v57 = vpop.f32.mrb[23].mxu0  ;;  %v1310_v58 = vpop.f32.mrb[23].mxu1 }
 0x2df   : > { %v1616_v59 = vmax.f32 %v1194_v49, 0.0  ;;  %v1618_v60 = vmax.f32 %v1307_v50, 0.0  ;;  %v1198_v61 = vadd.f32 %v1197_v57, %v2628_v13  ;;  %v1311_v62 = vadd.f32 %v1310_v58, %v2631_v14 }
 0x2e0   : > { %1743 = vst [vmem:[%s2643_s19 + $0x80] sm:$0xff] %v1615_v53  ;;  %1745 = vst [vmem:[%s2643_s19 + $0x90] sm:$0xff] %v1617_v54  ;;  %v1623_v63 = vmax.f32 %v1196_v55, 0.0  ;;  %v1625_v1 = vmax.f32 %v1309_v56, 0.0 }
 0x2e1   : > { %1744 = vst [vmem:[%s2643_s19 + $0x88] sm:$0xff] %v1616_v59  ;;  %1746 = vst [vmem:[%s2643_s19 + $0x98] sm:$0xff] %v1618_v60  ;;  %v1624_v2 = vmax.f32 %v1198_v61, 0.0  ;;  %v1626_v3 = vmax.f32 %v1311_v62, 0.0 }
 0x2e2   : > { %1751 = vst [vmem:[%s2643_s19 + $0xc0] sm:$0xff] %v1623_v63  ;;  %1753 = vst [vmem:[%s2643_s19 + $0xd0] sm:$0xff] %v1625_v1 }
 0x2e3   : > { %1752 = vst [vmem:[%s2643_s19 + $0xc8] sm:$0xff] %v1624_v2  ;;  %1754 = vst [vmem:[%s2643_s19 + $0xd8] sm:$0xff] %v1626_v3  ;;  %v1201_v4 = vpop.f32.mrb[24].mxu0  ;;  %v1314_v19 = vpop.f32.mrb[24].mxu1 }
 0x2e4   : > { %v1202_v5 = vadd.f32 %v1201_v4, %v2622_v11  ;;  %v1315_v6 = vadd.f32 %v1314_v19, %v2625_v12  ;;  %v1203_v7 = vpop.f32.mrb[25].mxu0  ;;  %v1316_v35 = vpop.f32.mrb[25].mxu1 }
 0x2e5   : > { %v1204_v0 = vadd.f32 %v1203_v7, %v2628_v13  ;;  %v1317_v44 = vadd.f32 %v1316_v35, %v2631_v14  ;;  %v1205_v10 = vpop.f32.mrb[26].mxu0  ;;  %v1318_v9 = vpop.f32.mrb[26].mxu1 }
 0x2e6   : > { %v1631_v15 = vmax.f32 %v1202_v5, 0.0  ;;  %v1633_v16 = vmax.f32 %v1315_v6, 0.0  ;;  %v1206_v17 = vadd.f32 %v1205_v10, %v2622_v11  ;;  %v1319_v20 = vadd.f32 %v1318_v9, %v2625_v12  ;;  %v1207_v22 = vpop.f32.mrb[27].mxu0  ;;  %v1320_v23 = vpop.f32.mrb[27].mxu1 }
 0x2e7   : > { %v1632_v25 = vmax.f32 %v1204_v0, 0.0  ;;  %v1634_v18 = vmax.f32 %v1317_v44, 0.0  ;;  %v1208_v21 = vadd.f32 %v1207_v22, %v2628_v13  ;;  %v1321_v24 = vadd.f32 %v1320_v23, %v2631_v14 }
 0x2e8   : > { %1759 = vst [vmem:[%s2643_s19 + $0x100] sm:$0xff] %v1631_v15  ;;  %1761 = vst [vmem:[%s2643_s19 + $0x110] sm:$0xff] %v1633_v16  ;;  %v1639_v26 = vmax.f32 %v1206_v17, 0.0  ;;  %v1641_v27 = vmax.f32 %v1319_v20, 0.0 }
 0x2e9   : > { %1760 = vst [vmem:[%s2643_s19 + $0x108] sm:$0xff] %v1632_v25  ;;  %1762 = vst [vmem:[%s2643_s19 + $0x118] sm:$0xff] %v1634_v18  ;;  %v1640_v28 = vmax.f32 %v1208_v21, 0.0  ;;  %v1642_v29 = vmax.f32 %v1321_v24, 0.0 }
 0x2ea   : > { %1767 = vst [vmem:[%s2643_s19 + $0x140] sm:$0xff] %v1639_v26  ;;  %1769 = vst [vmem:[%s2643_s19 + $0x150] sm:$0xff] %v1641_v27 }
 0x2eb   : > { %1768 = vst [vmem:[%s2643_s19 + $0x148] sm:$0xff] %v1640_v28  ;;  %1770 = vst [vmem:[%s2643_s19 + $0x158] sm:$0xff] %v1642_v29  ;;  %v1211_v30 = vpop.f32.mrb[28].mxu0  ;;  %v1324_v31 = vpop.f32.mrb[28].mxu1 }
 0x2ec   : > { %v1212_v32 = vadd.f32 %v1211_v30, %v2622_v11  ;;  %v1325_v33 = vadd.f32 %v1324_v31, %v2625_v12  ;;  %v1213_v34 = vpop.f32.mrb[29].mxu0  ;;  %v1326_v37 = vpop.f32.mrb[29].mxu1 }
 0x2ed   : > { %v1214_v38 = vadd.f32 %v1213_v34, %v2628_v13  ;;  %v1327_v39 = vadd.f32 %v1326_v37, %v2631_v14  ;;  %v1215_v40 = vpop.f32.mrb[30].mxu0  ;;  %v1328_v41 = vpop.f32.mrb[30].mxu1 }
 0x2ee   : > { %v1647_v42 = vmax.f32 %v1212_v32, 0.0  ;;  %v1649_v43 = vmax.f32 %v1325_v33, 0.0  ;;  %v1216_v45 = vadd.f32 %v1215_v40, %v2622_v11  ;;  %v1329_v46 = vadd.f32 %v1328_v41, %v2625_v12  ;;  %v1217_v47 = vpop.f32.mrb[31].mxu0  ;;  %v1330_v48 = vpop.f32.mrb[31].mxu1 }
 0x2ef   : > { %v1648_v49 = vmax.f32 %v1214_v38, 0.0  ;;  %v1650_v50 = vmax.f32 %v1327_v39, 0.0  ;;  %v1218_v51 = vadd.f32 %v1217_v47, %v2628_v13  ;;  %v1331_v52 = vadd.f32 %v1330_v48, %v2631_v14 }
 0x2f0   : > { %1775 = vst [vmem:[%s2643_s19 + $0x180] sm:$0xff] %v1647_v42  ;;  %1777 = vst [vmem:[%s2643_s19 + $0x190] sm:$0xff] %v1649_v43  ;;  %v1655_v53 = vmax.f32 %v1216_v45, 0.0  ;;  %v1657_v54 = vmax.f32 %v1329_v46, 0.0 }
 0x2f1   : > { %1776 = vst [vmem:[%s2643_s19 + $0x188] sm:$0xff] %v1648_v49  ;;  %1778 = vst [vmem:[%s2643_s19 + $0x198] sm:$0xff] %v1650_v50  ;;  %v1656_v55 = vmax.f32 %v1218_v51, 0.0  ;;  %v1658_v56 = vmax.f32 %v1331_v52, 0.0 }
 0x2f2   : > { %1783 = vst [vmem:[%s2643_s19 + $0x1c0] sm:$0xff] %v1655_v53  ;;  %1785 = vst [vmem:[%s2643_s19 + $0x1d0] sm:$0xff] %v1657_v54 }
 0x2f3   : > { %1784 = vst [vmem:[%s2643_s19 + $0x1c8] sm:$0xff] %v1656_v55  ;;  %1786 = vst [vmem:[%s2643_s19 + $0x1d8] sm:$0xff] %v1658_v56  ;;  %v1221_v57 = vpop.f32.mrb[32].mxu0  ;;  %v1334_v58 = vpop.f32.mrb[32].mxu1 }
 0x2f4   : > { %v1222_v59 = vadd.f32 %v1221_v57, %v2622_v11  ;;  %v1335_v60 = vadd.f32 %v1334_v58, %v2625_v12  ;;  %v1223_v61 = vpop.f32.mrb[33].mxu0  ;;  %v1336_v62 = vpop.f32.mrb[33].mxu1 }
 0x2f5   : > { %v1224_v63 = vadd.f32 %v1223_v61, %v2628_v13  ;;  %v1337_v1 = vadd.f32 %v1336_v62, %v2631_v14  ;;  %v1225_v2 = vpop.f32.mrb[34].mxu0  ;;  %v1338_v3 = vpop.f32.mrb[34].mxu1 }
 0x2f6   : > { %v1663_v4 = vmax.f32 %v1222_v59, 0.0  ;;  %v1665_v19 = vmax.f32 %v1335_v60, 0.0  ;;  %v1226_v5 = vadd.f32 %v1225_v2, %v2622_v11  ;;  %v1339_v6 = vadd.f32 %v1338_v3, %v2625_v12  ;;  %v1227_v7 = vpop.f32.mrb[35].mxu0  ;;  %v1340_v35 = vpop.f32.mrb[35].mxu1 }
 0x2f7   : > { %v1664_v0 = vmax.f32 %v1224_v63, 0.0  ;;  %v1666_v44 = vmax.f32 %v1337_v1, 0.0  ;;  %v1228_v10 = vadd.f32 %v1227_v7, %v2628_v13  ;;  %v1341_v9 = vadd.f32 %v1340_v35, %v2631_v14 }
 0x2f8   : > { %1791 = vst [vmem:[%s2643_s19 + $0x200] sm:$0xff] %v1663_v4  ;;  %1793 = vst [vmem:[%s2643_s19 + $0x210] sm:$0xff] %v1665_v19  ;;  %v1671_v15 = vmax.f32 %v1226_v5, 0.0  ;;  %v1673_v16 = vmax.f32 %v1339_v6, 0.0 }
 0x2f9   : > { %1792 = vst [vmem:[%s2643_s19 + $0x208] sm:$0xff] %v1664_v0  ;;  %1794 = vst [vmem:[%s2643_s19 + $0x218] sm:$0xff] %v1666_v44  ;;  %v1672_v17 = vmax.f32 %v1228_v10, 0.0  ;;  %v1674_v20 = vmax.f32 %v1341_v9, 0.0 }
 0x2fa   : > { %1799 = vst [vmem:[%s2643_s19 + $0x240] sm:$0xff] %v1671_v15  ;;  %1801 = vst [vmem:[%s2643_s19 + $0x250] sm:$0xff] %v1673_v16  ;;  %v805_v15 = vsub.s32 4, %v2609_v36  ;;  %v813_v16 = vsub.s32 6, %v2609_v36 }
 0x2fb   : > { %1800 = vst [vmem:[%s2643_s19 + $0x248] sm:$0xff] %v1672_v17  ;;  %1802 = vst [vmem:[%s2643_s19 + $0x258] sm:$0xff] %v1674_v20  ;;  %v1231_v22 = vpop.f32.mrb[36].mxu0  ;;  %v1344_v23 = vpop.f32.mrb[36].mxu1 }
 0x2fc   : > { %v1232_v25 = vadd.f32 %v1231_v22, %v2622_v11  ;;  %v1345_v18 = vadd.f32 %v1344_v23, %v2625_v12  ;;  %v1233_v21 = vpop.f32.mrb[37].mxu0  ;;  %v1346_v24 = vpop.f32.mrb[37].mxu1 }
 0x2fd   : > { %v1234_v26 = vadd.f32 %v1233_v21, %v2628_v13  ;;  %v1347_v27 = vadd.f32 %v1346_v24, %v2631_v14  ;;  %v1235_v28 = vpop.f32.mrb[38].mxu0  ;;  %v1348_v29 = vpop.f32.mrb[38].mxu1 }
 0x2fe   : > { %v1679_v30 = vmax.f32 %v1232_v25, 0.0  ;;  %v1681_v31 = vmax.f32 %v1345_v18, 0.0  ;;  %v1236_v32 = vadd.f32 %v1235_v28, %v2622_v11  ;;  %v1349_v33 = vadd.f32 %v1348_v29, %v2625_v12  ;;  %v1237_v34 = vpop.f32.mrb[39].mxu0  ;;  %v1350_v37 = vpop.f32.mrb[39].mxu1 }
 0x2ff   : > { %v1680_v38 = vmax.f32 %v1234_v26, 0.0  ;;  %v1682_v39 = vmax.f32 %v1347_v27, 0.0  ;;  %v1238_v40 = vadd.f32 %v1237_v34, %v2628_v13  ;;  %v1351_v41 = vadd.f32 %v1350_v37, %v2631_v14 }
 0x300   : > { %1807 = vst [vmem:[%s2643_s19 + $0x280] sm:$0xff] %v1679_v30  ;;  %1809 = vst [vmem:[%s2643_s19 + $0x290] sm:$0xff] %v1681_v31  ;;  %v1687_v42 = vmax.f32 %v1236_v32, 0.0  ;;  %v1689_v43 = vmax.f32 %v1349_v33, 0.0  ;;  %v809_v25 = vsub.s32 5, %v2609_v36  ;;  %v817_v18 = vsub.s32 7, %v2609_v36 }
 0x301   : > { %1808 = vst [vmem:[%s2643_s19 + $0x288] sm:$0xff] %v1680_v38  ;;  %1810 = vst [vmem:[%s2643_s19 + $0x298] sm:$0xff] %v1682_v39  ;;  %v1688_v45 = vmax.f32 %v1238_v40, 0.0  ;;  %v1690_v46 = vmax.f32 %v1351_v41, 0.0 }
 0x302   : > { %1815 = vst [vmem:[%s2643_s19 + $0x2c0] sm:$0xff] %v1687_v42  ;;  %1817 = vst [vmem:[%s2643_s19 + $0x2d0] sm:$0xff] %v1689_v43 }
 0x303   : > { %1816 = vst [vmem:[%s2643_s19 + $0x2c8] sm:$0xff] %v1688_v45  ;;  %1818 = vst [vmem:[%s2643_s19 + $0x2d8] sm:$0xff] %v1690_v46  ;;  %v1241_v47 = vpop.f32.mrb[40].mxu0  ;;  %v1354_v48 = vpop.f32.mrb[40].mxu1 }
 0x304   : > { %v1242_v49 = vadd.f32 %v1241_v47, %v2622_v11  ;;  %v1355_v50 = vadd.f32 %v1354_v48, %v2625_v12  ;;  %v1243_v51 = vpop.f32.mrb[41].mxu0  ;;  %v1356_v52 = vpop.f32.mrb[41].mxu1 }
 0x305   : > { %v1244_v53 = vadd.f32 %v1243_v51, %v2628_v13  ;;  %v1357_v54 = vadd.f32 %v1356_v52, %v2631_v14  ;;  %v1245_v55 = vpop.f32.mrb[42].mxu0  ;;  %v1358_v56 = vpop.f32.mrb[42].mxu1 }
 0x306   : > { %v1695_v57 = vmax.f32 %v1242_v49, 0.0  ;;  %v1697_v58 = vmax.f32 %v1355_v50, 0.0  ;;  %v1246_v59 = vadd.f32 %v1245_v55, %v2622_v11  ;;  %v1359_v60 = vadd.f32 %v1358_v56, %v2625_v12  ;;  %v1247_v61 = vpop.f32.mrb[43].mxu0  ;;  %v1360_v62 = vpop.f32.mrb[43].mxu1 }
 0x307   : > { %v1696_v63 = vmax.f32 %v1244_v53, 0.0  ;;  %v1698_v1 = vmax.f32 %v1357_v54, 0.0  ;;  %v1248_v2 = vadd.f32 %v1247_v61, %v2628_v13  ;;  %v1361_v3 = vadd.f32 %v1360_v62, %v2631_v14 }
 0x308   : > { %1823 = vst [vmem:[%s2643_s19 + $0x300] sm:$0xff] %v1695_v57  ;;  %1825 = vst [vmem:[%s2643_s19 + $0x310] sm:$0xff] %v1697_v58  ;;  %v1703_v4 = vmax.f32 %v1246_v59, 0.0  ;;  %v1705_v19 = vmax.f32 %v1359_v60, 0.0 }
 0x309   : > { %1824 = vst [vmem:[%s2643_s19 + $0x308] sm:$0xff] %v1696_v63  ;;  %1826 = vst [vmem:[%s2643_s19 + $0x318] sm:$0xff] %v1698_v1  ;;  %v1704_v5 = vmax.f32 %v1248_v2, 0.0  ;;  %v1706_v6 = vmax.f32 %v1361_v3, 0.0 }
 0x30a   : > { %1831 = vst [vmem:[%s2643_s19 + $0x340] sm:$0xff] %v1703_v4  ;;  %1833 = vst [vmem:[%s2643_s19 + $0x350] sm:$0xff] %v1705_v19 }
 0x30b   : > { %1832 = vst [vmem:[%s2643_s19 + $0x348] sm:$0xff] %v1704_v5  ;;  %1834 = vst [vmem:[%s2643_s19 + $0x358] sm:$0xff] %v1706_v6  ;;  %v1251_v7 = vpop.f32.mrb[44].mxu0  ;;  %v1364_v35 = vpop.f32.mrb[44].mxu1 }
 0x30c   : > { %v1252_v0 = vadd.f32 %v1251_v7, %v2622_v11  ;;  %v1365_v44 = vadd.f32 %v1364_v35, %v2625_v12  ;;  %v1253_v10 = vpop.f32.mrb[45].mxu0  ;;  %v1366_v9 = vpop.f32.mrb[45].mxu1 }
 0x30d   : > { %v1254_v17 = vadd.f32 %v1253_v10, %v2628_v13  ;;  %v1367_v20 = vadd.f32 %v1366_v9, %v2631_v14  ;;  %v1255_v22 = vpop.f32.mrb[46].mxu0  ;;  %v1368_v23 = vpop.f32.mrb[46].mxu1 }
 0x30e   : > { %v1711_v21 = vmax.f32 %v1252_v0, 0.0  ;;  %v1713_v24 = vmax.f32 %v1365_v44, 0.0  ;;  %v1256_v26 = vadd.f32 %v1255_v22, %v2622_v11  ;;  %v1369_v27 = vadd.f32 %v1368_v23, %v2625_v12  ;;  %v1257_v28 = vpop.f32.mrb[47].mxu0  ;;  %v1370_v29 = vpop.f32.mrb[47].mxu1 }
 0x30f   : > { %v1712_v30 = vmax.f32 %v1254_v17, 0.0  ;;  %v1714_v31 = vmax.f32 %v1367_v20, 0.0  ;;  %v1258_v32 = vadd.f32 %v1257_v28, %v2628_v13  ;;  %v1371_v33 = vadd.f32 %v1370_v29, %v2631_v14 }
 0x310   : > { %1839 = vst [vmem:[%s2643_s19 + $0x380] sm:$0xff] %v1711_v21  ;;  %1841 = vst [vmem:[%s2643_s19 + $0x390] sm:$0xff] %v1713_v24  ;;  %v1719_v36 = vmax.f32 %v1256_v26, 0.0  ;;  %v1721_v34 = vmax.f32 %v1369_v27, 0.0  ;;  %v2764_v11 = vrot.slane %v2616_v8, %v805_v15  ;;  %v2767_v12 = vrot.slane %v2616_v8, %v813_v16 }
 0x311   : > { %1840 = vst [vmem:[%s2643_s19 + $0x388] sm:$0xff] %v1712_v30  ;;  %1842 = vst [vmem:[%s2643_s19 + $0x398] sm:$0xff] %v1714_v31  ;;  %v1720_v37 = vmax.f32 %v1258_v32, 0.0  ;;  %v1722_v38 = vmax.f32 %v1371_v33, 0.0  ;;  %v2772_v13 = vrot.slane %v2616_v8, %v809_v25  ;;  %v2775_v14 = vrot.slane %v2616_v8, %v817_v18 }
 0x312   : > { %1847 = vst [vmem:[%s2643_s19 + $0x3c0] sm:$0xff] %v1719_v36  ;;  %1849 = vst [vmem:[%s2643_s19 + $0x3d0] sm:$0xff] %v1721_v34 }
 0x313   : > { %1848 = vst [vmem:[%s2643_s19 + $0x3c8] sm:$0xff] %v1720_v37  ;;  %1850 = vst [vmem:[%s2643_s19 + $0x3d8] sm:$0xff] %v1722_v38  ;;  %v1407_v39 = vpop.f32.mrb[48].mxu0  ;;  %v1520_v40 = vpop.f32.mrb[48].mxu1 }
 0x314   : > { %v1408_v41 = vadd.f32 %v1407_v39, %v2764_v11  ;;  %v1521_v42 = vadd.f32 %v1520_v40, %v2767_v12  ;;  %v1409_v43 = vpop.f32.mrb[49].mxu0  ;;  %v1522_v45 = vpop.f32.mrb[49].mxu1 }
 0x315   : > { %v1410_v46 = vadd.f32 %v1409_v43, %v2772_v13  ;;  %v1523_v47 = vadd.f32 %v1522_v45, %v2775_v14  ;;  %v1411_v8 = vpop.f32.mrb[50].mxu0  ;;  %v1524_v48 = vpop.f32.mrb[50].mxu1 }
 0x316   : > { %v1603_v49 = vmax.f32 %v1408_v41, 0.0  ;;  %v1605_v50 = vmax.f32 %v1521_v42, 0.0  ;;  %v1412_v51 = vadd.f32 %v1411_v8, %v2764_v11  ;;  %v1525_v52 = vadd.f32 %v1524_v48, %v2767_v12  ;;  %v1413_v53 = vpop.f32.mrb[51].mxu0  ;;  %v1526_v54 = vpop.f32.mrb[51].mxu1 }
 0x317   : > { %v1604_v55 = vmax.f32 %v1410_v46, 0.0  ;;  %v1606_v56 = vmax.f32 %v1523_v47, 0.0  ;;  %v1414_v57 = vadd.f32 %v1413_v53, %v2772_v13  ;;  %v1527_v58 = vadd.f32 %v1526_v54, %v2775_v14 }
 0x318   : > { %1731 = vst [vmem:[%s2643_s19 + $0x20] sm:$0xff] %v1603_v49  ;;  %1733 = vst [vmem:[%s2643_s19 + $0x30] sm:$0xff] %v1605_v50  ;;  %v1611_v59 = vmax.f32 %v1412_v51, 0.0  ;;  %v1613_v60 = vmax.f32 %v1525_v52, 0.0 }
 0x319   : > { %1732 = vst [vmem:[%s2643_s19 + $0x28] sm:$0xff] %v1604_v55  ;;  %1734 = vst [vmem:[%s2643_s19 + $0x38] sm:$0xff] %v1606_v56  ;;  %v1612_v61 = vmax.f32 %v1414_v57, 0.0  ;;  %v1614_v62 = vmax.f32 %v1527_v58, 0.0 }
 0x31a   : > { %1739 = vst [vmem:[%s2643_s19 + $0x60] sm:$0xff] %v1611_v59  ;;  %1741 = vst [vmem:[%s2643_s19 + $0x70] sm:$0xff] %v1613_v60 }
 0x31b   : > { %1740 = vst [vmem:[%s2643_s19 + $0x68] sm:$0xff] %v1612_v61  ;;  %1742 = vst [vmem:[%s2643_s19 + $0x78] sm:$0xff] %v1614_v62  ;;  %v1417_v63 = vpop.f32.mrb[52].mxu0  ;;  %v1530_v1 = vpop.f32.mrb[52].mxu1 }
 0x31c   : > { %v1418_v2 = vadd.f32 %v1417_v63, %v2764_v11  ;;  %v1531_v3 = vadd.f32 %v1530_v1, %v2767_v12  ;;  %v1419_v4 = vpop.f32.mrb[53].mxu0  ;;  %v1532_v19 = vpop.f32.mrb[53].mxu1 }
 0x31d   : > { %v1420_v5 = vadd.f32 %v1419_v4, %v2772_v13  ;;  %v1533_v6 = vadd.f32 %v1532_v19, %v2775_v14  ;;  %v1421_v7 = vpop.f32.mrb[54].mxu0  ;;  %v1534_v35 = vpop.f32.mrb[54].mxu1 }
 0x31e   : > { %v1619_v0 = vmax.f32 %v1418_v2, 0.0  ;;  %v1621_v44 = vmax.f32 %v1531_v3, 0.0  ;;  %v1422_v10 = vadd.f32 %v1421_v7, %v2764_v11  ;;  %v1535_v9 = vadd.f32 %v1534_v35, %v2767_v12  ;;  %v1423_v15 = vpop.f32.mrb[55].mxu0  ;;  %v1536_v16 = vpop.f32.mrb[55].mxu1 }
 0x31f   : > { %v1620_v17 = vmax.f32 %v1420_v5, 0.0  ;;  %v1622_v20 = vmax.f32 %v1533_v6, 0.0  ;;  %v1424_v22 = vadd.f32 %v1423_v15, %v2772_v13  ;;  %v1537_v23 = vadd.f32 %v1536_v16, %v2775_v14 }
 0x320   : > { %1747 = vst [vmem:[%s2643_s19 + $0xa0] sm:$0xff] %v1619_v0  ;;  %1749 = vst [vmem:[%s2643_s19 + $0xb0] sm:$0xff] %v1621_v44  ;;  %v1627_v25 = vmax.f32 %v1422_v10, 0.0  ;;  %v1629_v18 = vmax.f32 %v1535_v9, 0.0 }
 0x321   : > { %1748 = vst [vmem:[%s2643_s19 + $0xa8] sm:$0xff] %v1620_v17  ;;  %1750 = vst [vmem:[%s2643_s19 + $0xb8] sm:$0xff] %v1622_v20  ;;  %v1628_v21 = vmax.f32 %v1424_v22, 0.0  ;;  %v1630_v24 = vmax.f32 %v1537_v23, 0.0 }
 0x322   : > { %1755 = vst [vmem:[%s2643_s19 + $0xe0] sm:$0xff] %v1627_v25  ;;  %1757 = vst [vmem:[%s2643_s19 + $0xf0] sm:$0xff] %v1629_v18 }
 0x323   : > { %1756 = vst [vmem:[%s2643_s19 + $0xe8] sm:$0xff] %v1628_v21  ;;  %1758 = vst [vmem:[%s2643_s19 + $0xf8] sm:$0xff] %v1630_v24  ;;  %v1427_v26 = vpop.f32.mrb[56].mxu0  ;;  %v1540_v27 = vpop.f32.mrb[56].mxu1 }
 0x324   : > { %v1428_v28 = vadd.f32 %v1427_v26, %v2764_v11  ;;  %v1541_v29 = vadd.f32 %v1540_v27, %v2767_v12  ;;  %v1429_v30 = vpop.f32.mrb[57].mxu0  ;;  %v1542_v31 = vpop.f32.mrb[57].mxu1 }
 0x325   : > { %v1430_v32 = vadd.f32 %v1429_v30, %v2772_v13  ;;  %v1543_v33 = vadd.f32 %v1542_v31, %v2775_v14  ;;  %v1431_v36 = vpop.f32.mrb[58].mxu0  ;;  %v1544_v34 = vpop.f32.mrb[58].mxu1 }
 0x326   : > { %v1635_v37 = vmax.f32 %v1428_v28, 0.0  ;;  %v1637_v38 = vmax.f32 %v1541_v29, 0.0  ;;  %v1432_v39 = vadd.f32 %v1431_v36, %v2764_v11  ;;  %v1545_v40 = vadd.f32 %v1544_v34, %v2767_v12  ;;  %v1433_v41 = vpop.f32.mrb[59].mxu0  ;;  %v1546_v42 = vpop.f32.mrb[59].mxu1 }
 0x327   : > { %v1636_v43 = vmax.f32 %v1430_v32, 0.0  ;;  %v1638_v45 = vmax.f32 %v1543_v33, 0.0  ;;  %v1434_v46 = vadd.f32 %v1433_v41, %v2772_v13  ;;  %v1547_v47 = vadd.f32 %v1546_v42, %v2775_v14 }
 0x328   : > { %1763 = vst [vmem:[%s2643_s19 + $0x120] sm:$0xff] %v1635_v37  ;;  %1765 = vst [vmem:[%s2643_s19 + $0x130] sm:$0xff] %v1637_v38  ;;  %v1643_v8 = vmax.f32 %v1432_v39, 0.0  ;;  %v1645_v48 = vmax.f32 %v1545_v40, 0.0 }
 0x329   : > { %1764 = vst [vmem:[%s2643_s19 + $0x128] sm:$0xff] %v1636_v43  ;;  %1766 = vst [vmem:[%s2643_s19 + $0x138] sm:$0xff] %v1638_v45  ;;  %v1644_v49 = vmax.f32 %v1434_v46, 0.0  ;;  %v1646_v50 = vmax.f32 %v1547_v47, 0.0 }
 0x32a   : > { %1771 = vst [vmem:[%s2643_s19 + $0x160] sm:$0xff] %v1643_v8  ;;  %1773 = vst [vmem:[%s2643_s19 + $0x170] sm:$0xff] %v1645_v48 }
 0x32b   : > { %1772 = vst [vmem:[%s2643_s19 + $0x168] sm:$0xff] %v1644_v49  ;;  %1774 = vst [vmem:[%s2643_s19 + $0x178] sm:$0xff] %v1646_v50  ;;  %v1437_v51 = vpop.f32.mrb[60].mxu0  ;;  %v1550_v52 = vpop.f32.mrb[60].mxu1 }
 0x32c   : > { %v1438_v53 = vadd.f32 %v1437_v51, %v2764_v11  ;;  %v1551_v54 = vadd.f32 %v1550_v52, %v2767_v12  ;;  %v1439_v55 = vpop.f32.mrb[61].mxu0  ;;  %v1552_v56 = vpop.f32.mrb[61].mxu1 }
 0x32d   : > { %v1440_v57 = vadd.f32 %v1439_v55, %v2772_v13  ;;  %v1553_v58 = vadd.f32 %v1552_v56, %v2775_v14  ;;  %v1441_v59 = vpop.f32.mrb[62].mxu0  ;;  %v1554_v60 = vpop.f32.mrb[62].mxu1 }
 0x32e   : > { %v1651_v61 = vmax.f32 %v1438_v53, 0.0  ;;  %v1653_v62 = vmax.f32 %v1551_v54, 0.0  ;;  %v1442_v63 = vadd.f32 %v1441_v59, %v2764_v11  ;;  %v1555_v1 = vadd.f32 %v1554_v60, %v2767_v12  ;;  %v1443_v2 = vpop.f32.mrb[63].mxu0  ;;  %v1556_v3 = vpop.f32.mrb[63].mxu1 }
 0x32f   : > { %v1652_v4 = vmax.f32 %v1440_v57, 0.0  ;;  %v1654_v19 = vmax.f32 %v1553_v58, 0.0  ;;  %v1444_v5 = vadd.f32 %v1443_v2, %v2772_v13  ;;  %v1557_v6 = vadd.f32 %v1556_v3, %v2775_v14 }
 0x330   : > { %1779 = vst [vmem:[%s2643_s19 + $0x1a0] sm:$0xff] %v1651_v61  ;;  %1781 = vst [vmem:[%s2643_s19 + $0x1b0] sm:$0xff] %v1653_v62  ;;  %v1659_v7 = vmax.f32 %v1442_v63, 0.0  ;;  %v1661_v35 = vmax.f32 %v1555_v1, 0.0 }
 0x331   : > { %1780 = vst [vmem:[%s2643_s19 + $0x1a8] sm:$0xff] %v1652_v4  ;;  %1782 = vst [vmem:[%s2643_s19 + $0x1b8] sm:$0xff] %v1654_v19  ;;  %v1660_v0 = vmax.f32 %v1444_v5, 0.0  ;;  %v1662_v44 = vmax.f32 %v1557_v6, 0.0 }
 0x332   : > { %1787 = vst [vmem:[%s2643_s19 + $0x1e0] sm:$0xff] %v1659_v7  ;;  %1789 = vst [vmem:[%s2643_s19 + $0x1f0] sm:$0xff] %v1661_v35 }
 0x333   : > { %1788 = vst [vmem:[%s2643_s19 + $0x1e8] sm:$0xff] %v1660_v0  ;;  %1790 = vst [vmem:[%s2643_s19 + $0x1f8] sm:$0xff] %v1662_v44  ;;  %v1447_v10 = vpop.f32.mrb[64].mxu0  ;;  %v1560_v9 = vpop.f32.mrb[64].mxu1 }
 0x334   : > { %v1448_v15 = vadd.f32 %v1447_v10, %v2764_v11  ;;  %v1561_v16 = vadd.f32 %v1560_v9, %v2767_v12  ;;  %v1449_v17 = vpop.f32.mrb[65].mxu0  ;;  %v1562_v20 = vpop.f32.mrb[65].mxu1 }
 0x335   : > { %v1450_v22 = vadd.f32 %v1449_v17, %v2772_v13  ;;  %v1563_v23 = vadd.f32 %v1562_v20, %v2775_v14  ;;  %v1451_v25 = vpop.f32.mrb[66].mxu0  ;;  %v1564_v18 = vpop.f32.mrb[66].mxu1 }
 0x336   : > { %v1667_v21 = vmax.f32 %v1448_v15, 0.0  ;;  %v1669_v24 = vmax.f32 %v1561_v16, 0.0  ;;  %v1452_v26 = vadd.f32 %v1451_v25, %v2764_v11  ;;  %v1565_v27 = vadd.f32 %v1564_v18, %v2767_v12  ;;  %v1453_v28 = vpop.f32.mrb[67].mxu0  ;;  %v1566_v29 = vpop.f32.mrb[67].mxu1 }
 0x337   : > { %v1668_v30 = vmax.f32 %v1450_v22, 0.0  ;;  %v1670_v31 = vmax.f32 %v1563_v23, 0.0  ;;  %v1454_v32 = vadd.f32 %v1453_v28, %v2772_v13  ;;  %v1567_v33 = vadd.f32 %v1566_v29, %v2775_v14 }
 0x338   : > { %1795 = vst [vmem:[%s2643_s19 + $0x220] sm:$0xff] %v1667_v21  ;;  %1797 = vst [vmem:[%s2643_s19 + $0x230] sm:$0xff] %v1669_v24  ;;  %v1675_v36 = vmax.f32 %v1452_v26, 0.0  ;;  %v1677_v34 = vmax.f32 %v1565_v27, 0.0 }
 0x339   : > { %1796 = vst [vmem:[%s2643_s19 + $0x228] sm:$0xff] %v1668_v30  ;;  %1798 = vst [vmem:[%s2643_s19 + $0x238] sm:$0xff] %v1670_v31  ;;  %v1676_v37 = vmax.f32 %v1454_v32, 0.0  ;;  %v1678_v38 = vmax.f32 %v1567_v33, 0.0 }
 0x33a   : > { %1803 = vst [vmem:[%s2643_s19 + $0x260] sm:$0xff] %v1675_v36  ;;  %1805 = vst [vmem:[%s2643_s19 + $0x270] sm:$0xff] %v1677_v34 }
 0x33b   : > { %1804 = vst [vmem:[%s2643_s19 + $0x268] sm:$0xff] %v1676_v37  ;;  %1806 = vst [vmem:[%s2643_s19 + $0x278] sm:$0xff] %v1678_v38  ;;  %v1457_v39 = vpop.f32.mrb[68].mxu0  ;;  %v1570_v40 = vpop.f32.mrb[68].mxu1 }
 0x33c   : > { %v1458_v41 = vadd.f32 %v1457_v39, %v2764_v11  ;;  %v1571_v42 = vadd.f32 %v1570_v40, %v2767_v12  ;;  %v1459_v43 = vpop.f32.mrb[69].mxu0  ;;  %v1572_v45 = vpop.f32.mrb[69].mxu1 }
 0x33d   : > { %v1460_v46 = vadd.f32 %v1459_v43, %v2772_v13  ;;  %v1573_v47 = vadd.f32 %v1572_v45, %v2775_v14  ;;  %v1461_v8 = vpop.f32.mrb[70].mxu0  ;;  %v1574_v48 = vpop.f32.mrb[70].mxu1 }
 0x33e   : > { %v1683_v49 = vmax.f32 %v1458_v41, 0.0  ;;  %v1685_v50 = vmax.f32 %v1571_v42, 0.0  ;;  %v1462_v51 = vadd.f32 %v1461_v8, %v2764_v11  ;;  %v1575_v52 = vadd.f32 %v1574_v48, %v2767_v12  ;;  %v1463_v53 = vpop.f32.mrb[71].mxu0  ;;  %v1576_v54 = vpop.f32.mrb[71].mxu1 }
 0x33f   : > { %v1684_v55 = vmax.f32 %v1460_v46, 0.0  ;;  %v1686_v56 = vmax.f32 %v1573_v47, 0.0  ;;  %v1464_v57 = vadd.f32 %v1463_v53, %v2772_v13  ;;  %v1577_v58 = vadd.f32 %v1576_v54, %v2775_v14 }
 0x340   : > { %1811 = vst [vmem:[%s2643_s19 + $0x2a0] sm:$0xff] %v1683_v49  ;;  %1813 = vst [vmem:[%s2643_s19 + $0x2b0] sm:$0xff] %v1685_v50  ;;  %v1691_v59 = vmax.f32 %v1462_v51, 0.0  ;;  %v1693_v60 = vmax.f32 %v1575_v52, 0.0 }
 0x341   : > { %1812 = vst [vmem:[%s2643_s19 + $0x2a8] sm:$0xff] %v1684_v55  ;;  %1814 = vst [vmem:[%s2643_s19 + $0x2b8] sm:$0xff] %v1686_v56  ;;  %v1692_v61 = vmax.f32 %v1464_v57, 0.0  ;;  %v1694_v62 = vmax.f32 %v1577_v58, 0.0 }
 0x342   : > { %1819 = vst [vmem:[%s2643_s19 + $0x2e0] sm:$0xff] %v1691_v59  ;;  %1821 = vst [vmem:[%s2643_s19 + $0x2f0] sm:$0xff] %v1693_v60 }
 0x343   : > { %1820 = vst [vmem:[%s2643_s19 + $0x2e8] sm:$0xff] %v1692_v61  ;;  %1822 = vst [vmem:[%s2643_s19 + $0x2f8] sm:$0xff] %v1694_v62  ;;  %v1467_v63 = vpop.f32.mrb[72].mxu0  ;;  %v1580_v1 = vpop.f32.mrb[72].mxu1 }
 0x344   : > { %v1468_v2 = vadd.f32 %v1467_v63, %v2764_v11  ;;  %v1581_v3 = vadd.f32 %v1580_v1, %v2767_v12  ;;  %v1469_v4 = vpop.f32.mrb[73].mxu0  ;;  %v1582_v19 = vpop.f32.mrb[73].mxu1 }
 0x345   : > { %v1470_v5 = vadd.f32 %v1469_v4, %v2772_v13  ;;  %v1583_v6 = vadd.f32 %v1582_v19, %v2775_v14  ;;  %v1471_v7 = vpop.f32.mrb[74].mxu0  ;;  %v1584_v35 = vpop.f32.mrb[74].mxu1 }
 0x346   : > { %v1699_v0 = vmax.f32 %v1468_v2, 0.0  ;;  %v1701_v44 = vmax.f32 %v1581_v3, 0.0  ;;  %v1472_v10 = vadd.f32 %v1471_v7, %v2764_v11  ;;  %v1585_v9 = vadd.f32 %v1584_v35, %v2767_v12  ;;  %v1473_v15 = vpop.f32.mrb[75].mxu0  ;;  %v1586_v16 = vpop.f32.mrb[75].mxu1 }
 0x347   : > { %v1700_v17 = vmax.f32 %v1470_v5, 0.0  ;;  %v1702_v20 = vmax.f32 %v1583_v6, 0.0  ;;  %v1474_v22 = vadd.f32 %v1473_v15, %v2772_v13  ;;  %v1587_v23 = vadd.f32 %v1586_v16, %v2775_v14 }
 0x348   : > { %1827 = vst [vmem:[%s2643_s19 + $0x320] sm:$0xff] %v1699_v0  ;;  %1829 = vst [vmem:[%s2643_s19 + $0x330] sm:$0xff] %v1701_v44  ;;  %v1707_v25 = vmax.f32 %v1472_v10, 0.0  ;;  %v1709_v18 = vmax.f32 %v1585_v9, 0.0 }
 0x349   : > { %1828 = vst [vmem:[%s2643_s19 + $0x328] sm:$0xff] %v1700_v17  ;;  %1830 = vst [vmem:[%s2643_s19 + $0x338] sm:$0xff] %v1702_v20  ;;  %v1708_v21 = vmax.f32 %v1474_v22, 0.0  ;;  %v1710_v24 = vmax.f32 %v1587_v23, 0.0 }
 0x34a   : > { %1835 = vst [vmem:[%s2643_s19 + $0x360] sm:$0xff] %v1707_v25  ;;  %1837 = vst [vmem:[%s2643_s19 + $0x370] sm:$0xff] %v1709_v18 }
 0x34b   : > { %1836 = vst [vmem:[%s2643_s19 + $0x368] sm:$0xff] %v1708_v21  ;;  %1838 = vst [vmem:[%s2643_s19 + $0x378] sm:$0xff] %v1710_v24  ;;  %v1477_v26 = vpop.f32.mrb[76].mxu0  ;;  %v1590_v27 = vpop.f32.mrb[76].mxu1 }
 0x34c   : > { %v1478_v28 = vadd.f32 %v1477_v26, %v2764_v11  ;;  %v1591_v29 = vadd.f32 %v1590_v27, %v2767_v12  ;;  %v1479_v30 = vpop.f32.mrb[77].mxu0  ;;  %v1592_v31 = vpop.f32.mrb[77].mxu1 }
 0x34d   : > { %v1480_v32 = vadd.f32 %v1479_v30, %v2772_v13  ;;  %v1593_v33 = vadd.f32 %v1592_v31, %v2775_v14  ;;  %v1481_v36 = vpop.f32.mrb[78].mxu0  ;;  %v1594_v34 = vpop.f32.mrb[78].mxu1 }
 0x34e   : > { %v1715_v37 = vmax.f32 %v1478_v28, 0.0  ;;  %v1717_v38 = vmax.f32 %v1591_v29, 0.0  ;;  %v1482_v39 = vadd.f32 %v1481_v36, %v2764_v11  ;;  %v1595_v40 = vadd.f32 %v1594_v34, %v2767_v12  ;;  %v1483_v41 = vpop.f32.mrb[79].mxu0  ;;  %v1596_v42 = vpop.f32.mrb[79].mxu1 }
 0x34f   : > { %v1716_v43 = vmax.f32 %v1480_v32, 0.0  ;;  %v1718_v45 = vmax.f32 %v1593_v33, 0.0  ;;  %v1484_v46 = vadd.f32 %v1483_v41, %v2772_v13  ;;  %v1597_v47 = vadd.f32 %v1596_v42, %v2775_v14 }
 0x350   : > { %1843 = vst [vmem:[%s2643_s19 + $0x3a0] sm:$0xff] %v1715_v37  ;;  %1845 = vst [vmem:[%s2643_s19 + $0x3b0] sm:$0xff] %v1717_v38  ;;  %v1723_v8 = vmax.f32 %v1482_v39, 0.0  ;;  %v1725_v11 = vmax.f32 %v1595_v40, 0.0 }
 0x351   : > { %1844 = vst [vmem:[%s2643_s19 + $0x3a8] sm:$0xff] %v1716_v43  ;;  %1846 = vst [vmem:[%s2643_s19 + $0x3b8] sm:$0xff] %v1718_v45  ;;  %v1724_v12 = vmax.f32 %v1484_v46, 0.0  ;;  %v1726_v13 = vmax.f32 %v1597_v47, 0.0 }
 0x352   : > { %1851 = vst [vmem:[%s2643_s19 + $0x3e0] sm:$0xff] %v1723_v8  ;;  %1853 = vst [vmem:[%s2643_s19 + $0x3f0] sm:$0xff] %v1725_v11 }
 0x353   : > { %1852 = vst [vmem:[%s2643_s19 + $0x3e8] sm:$0xff] %v1724_v12  ;;  %1854 = vst [vmem:[%s2643_s19 + $0x3f8] sm:$0xff] %v1726_v13 }
 0x354   : > { %2243 = shalt.err (!%p2240_p7)
}
 0x355   : > { %s2244_s9 = scalar_lea.hbm %s2908_s15, 16384  ;;  %s2248_s18 = scalar_lea.hbm %s2968_s7, 32768 }
 0x356   : > { %p2245_p8 = scmp.ne.s32.totalorder %s2908_s15, %s2244_s9  ;;  %p2249_p1 = scmp.lt.u32.totalorder %s2908_s15, %s2968_s7 }
 0x357   : > { %p2250_p0 = scmp.lt.u32.totalorder %s2248_s18, %s2244_s9  ;;  %p2252_p6 = scmp.lt.u32.totalorder %s2244_s9, %s2908_s15 }
 0x358   : > { %p2246_p11 = pnand %p2245_p8, %p2979_p9 }
 0x359   : > { %p2251_p5 = por %p2250_p0, %p2249_p1 }
 0x35a   : > { %p2247_p13 = pneg %p2246_p11 }
 0x35b   : > { %p2253_p10 = por %p2252_p6, %p2251_p5 }
 0x35d   : > { %p2254_p12 = pnand %p2253_p10, %p2247_p13 }
 0x35f   : > { %2257 = shalt.err (!%p2254_p12)
}
 0x360   : > { %s2303_s28 = smov 1024   ;;  %s2304_s21 = smov 64  }
 0x361   : > { %2135 = dma.vmem_to_hbm [thread:$0]  (%p2979_p9), %s2910_s16, 16384, %s2908_s15, %s2920_s13, %s2303_s28, %s2303_s28, %s2304_s21  }
 0x362 PF: > { %p2147_p2 = scmp.ge.s32.totalorder %s2296_s27, 2  ;;  %s1885_s22 = sand.u32 1, %s2284_s24  }
 0x363   : > { %p2980_p3 = scmp.ne.s32.totalorder %s2973_s12, 0  ;;  %s1886_s23 = scalar_lea.sflag [#allocation4], %s1885_s22 }
 0x365   : > { %p2142_p4 = pnand %p2147_p2, %p2980_p3 }
 0x367   : > { %2279 = dma.done.wait (!%p2142_p4), %s1886_s23, 16384  }
 0x368   : > { %2281 = vsyncadd (!%p2142_p4), %s1886_s23, 4294950912  ;;  %p18_p7 = scmp.ge.s32.totalorder %s2370_s30, 4   ;;  %s2981_s24 = smov %s2288_s25 }
 0x369   : > { %s2982_s25 = smov %s2292_s26  ;;  %s2983_s26 = smov %s2381_s10 }
 0x36a   : > { %s2984_s27 = smov %s2370_s30  ;;  %20 = sbr.rel (!%p18_p7) target bundleno = 4 (0x4), region = 88 }
 0x371   :  { %1891 = vsyncpa [#allocation3], 1 }
 0x372   :  { %1893 = vsyncpa [#allocation3 + $0x1], 1 }
 0x373   :  { %1894 = vsyncpa [#allocation4], 1 }
 0x374   :  { %1896 = vsyncpa [#allocation4 + $0x1], 1 }

</bundles_post_ra>
